<compile_context>
chip_gen: v7x
topology: tpu7x:2x2x1
jax: 0.10.0
libtpu: 0.0.40
codegen_flags: <defaults>
</compile_context>

<pallas_src>
import functools
import math

import jax
import jax.numpy as jnp
from jax.experimental import pallas as pl
from jax.experimental.pallas import tpu as pltpu

# ---- small RoBERTa-like config (synthetic, deterministic init; no checkpoint) ----
VOCAB_SIZE = 100
HIDDEN = 32
N_HEADS = 4
HEAD_DIM = HIDDEN // N_HEADS
INTERMEDIATE = 64
N_LAYERS = 2
MAX_POS = 64 + 2          # RoBERTa reserves positions 0/1 (padding offset)
PAD_IDX = 1               # RoBERTa pad_token_id
LN_EPS = 1e-5
INIT_STD = 0.02
MASK_NEG = -1e9           # finite additive mask (avoids -inf -> NaN on fully-masked rows)

# packed-weight layout constants
W_IN_COLS = 3 * HIDDEN + HIDDEN + INTERMEDIATE   # [wqkv | wo | wf1] along lanes = 192
VEC_COLS = 3 * HIDDEN                            # widest packed vector row (bqkv) = 96
NVEC = 9                                         # 8 per-layer vectors + 1 emb-LN row (layer 0 only)


# ------------------------------ in-kernel helpers ------------------------------

def _layernorm(h, g, b, eps):
    mu = jnp.mean(h, axis=-1, keepdims=True)
    d = h - mu
    var = jnp.mean(d * d, axis=-1, keepdims=True)
    return d * jax.lax.rsqrt(var + eps) * g + b


def _gelu(y):
    # TODO(synk): HF RoBERTa uses exact erf-GELU; tanh approximation used in-kernel.
    return 0.5 * y * (1.0 + jnp.tanh(0.7978845608028654 * (y + 0.044715 * y * y * y)))


# ------------------------------- fused Pallas kernel -------------------------------

def _encoder_stack_kernel(x_ref, bias_ref, w_ref, wf2_ref, vec_ref,
                          emb_out_ref, hs_out_ref, h_scr, *, eps, batch, seq):
    """Grid axis = layer index. Activation (B*S, H) stays resident in h_scr across layers."""
    l = pl.program_id(0)

    # ---- grid step 0: embedding LayerNorm folded in (no standalone LN kernel) ----
    @pl.when(l == 0)
    def _():
        eg = vec_ref[8:9, 0:HIDDEN]                 # emb-LN gamma (stored in layer-0 vec slab)
        eb = vec_ref[8:9, HIDDEN:2 * HIDDEN]        # emb-LN beta
        h0 = _layernorm(x_ref[...], eg, eb, eps)
        h_scr[...] = h0
        emb_out_ref[...] = h0                       # hidden_states[0]

    x = h_scr[...]                                  # (B*S, H) resident activation

    # packed per-layer parameters (this layer's slabs, selected by the index_map)
    wqkv = w_ref[:, 0:3 * HIDDEN]                               # (H, 3H); scale folded into Q
    wo = w_ref[:, 3 * HIDDEN:4 * HIDDEN]                        # (H, H)
    wf1 = w_ref[:, 4 * HIDDEN:4 * HIDDEN + INTERMEDIATE]        # (H, FF)
    wf2 = wf2_ref[...]                                          # (FF, H)
    bqkv = vec_ref[0:1, 0:3 * HIDDEN]
    bo = vec_ref[1:2, 0:HIDDEN]
    g1 = vec_ref[2:3, 0:HIDDEN]
    b1 = vec_ref[3:4, 0:HIDDEN]
    bf1 = vec_ref[4:5, 0:INTERMEDIATE]
    bf2 = vec_ref[5:6, 0:HIDDEN]
    g2 = vec_ref[6:7, 0:HIDDEN]
    b2 = vec_ref[7:8, 0:HIDDEN]

    # ---- fused QKV projection over the FULL (B*S, H) slab (token-parallel) ----
    qkv = jnp.dot(x, wqkv, preferred_element_type=jnp.float32) + bqkv     # (B*S, 3H)

    # ---- attention: loop over batch (per-batch mask); per-head output accumulated
    #      directly through the output projection (no lane concat of heads) ----
    parts = []
    for b in range(batch):              # static unroll; tiny B (fori_loop if B grows)
        r0 = b * seq
        bias_b = bias_ref[b]            # (1, S) additive key mask, broadcast over query rows
        acc_b = None
        for h in range(N_HEADS):        # static unroll; 4 tiny heads (fori_loop at 12+ heads)
            c0 = h * HEAD_DIM
            q_h = qkv[r0:r0 + seq, c0:c0 + HEAD_DIM]
            k_h = qkv[r0:r0 + seq, HIDDEN + c0:HIDDEN + c0 + HEAD_DIM]
            v_h = qkv[r0:r0 + seq, 2 * HIDDEN + c0:2 * HIDDEN + c0 + HEAD_DIM]
            # q @ k^T without materializing a transpose (contract on the head dim of both)
            s = jax.lax.dot_general(q_h, k_h, (((1,), (1,)), ((), ())),
                                    preferred_element_type=jnp.float32)   # (S, S)
            s = s + bias_b
            s = s - jnp.max(s, axis=-1, keepdims=True)
            p = jnp.exp(s)
            p = p * pl.reciprocal(jnp.sum(p, axis=-1, keepdims=True), approx=True)
            hv = jnp.dot(p, v_h, preferred_element_type=jnp.float32)      # (S, HEAD_DIM)
            contrib = jnp.dot(hv, wo[c0:c0 + HEAD_DIM, :],
                              preferred_element_type=jnp.float32)         # (S, H)
            acc_b = contrib if acc_b is None else acc_b + contrib
        parts.append(acc_b)
    attn = jnp.concatenate(parts, axis=0) + bo        # (B*S, H) — sublane concat over batch

    # ---- residual + LN, FFN(GELU), residual + LN — all on the full slab ----
    x1 = _layernorm(attn + x, g1, b1, eps)
    hmid = _gelu(jnp.dot(x1, wf1, preferred_element_type=jnp.float32) + bf1)
    ffn = jnp.dot(hmid, wf2, preferred_element_type=jnp.float32) + bf2
    y = _layernorm(ffn + x1, g2, b2, eps)

    h_scr[...] = y                                    # carry activation to the next layer step
    hs_out_ref[...] = y                               # hidden_states[l + 1]


def encoder_stack(x, bias3d, fused, *, batch, seq):
    """x: [B*S, H] pre-LN embeddings; bias3d: [B, 1, S]; fused: stacked per-layer weights.

    Returns (emb_hidden [B*S, H], layer_hidden [N_LAYERS, B*S, H]).
    """
    n, hdim = x.shape
    kernel = functools.partial(_encoder_stack_kernel, eps=LN_EPS, batch=batch, seq=seq)
    return pl.pallas_call(
        kernel,
        out_shape=(
            jax.ShapeDtypeStruct((n, hdim), jnp.float32),            # embedding-LN output
            jax.ShapeDtypeStruct((N_LAYERS, n, hdim), jnp.float32),  # per-layer outputs
        ),
        grid=(N_LAYERS,),
        in_specs=[
            pl.BlockSpec((n, hdim), lambda l: (0, 0)),                       # embeddings
            pl.BlockSpec((batch, 1, seq), lambda l: (0, 0, 0)),              # additive mask
            pl.BlockSpec((None, hdim, W_IN_COLS), lambda l: (l, 0, 0)),      # [wqkv|wo|wf1]
            pl.BlockSpec((None, INTERMEDIATE, hdim), lambda l: (l, 0, 0)),   # wf2
            pl.BlockSpec((None, NVEC, VEC_COLS), lambda l: (l, 0, 0)),       # packed vectors
        ],
        out_specs=(
            pl.BlockSpec((n, hdim), lambda l: (0, 0)),
            pl.BlockSpec((None, n, hdim), lambda l: (l, 0, 0)),
        ),
        scratch_shapes=[pltpu.VMEM((n, hdim), jnp.float32)],   # resident activation
        # layer axis carries the activation dependency -> must stay "arbitrary".
        # (At scale: add vmem_limit_bytes=... here and a "parallel" row axis for v7x.)
        compiler_params=pltpu.CompilerParams(dimension_semantics=("arbitrary",)),
    )(x, bias3d, fused["w_in"], fused["wf2"], fused["vecs"])


# ----------------------------- parameters (synthetic) -----------------------------

def init_params(key):
    keys = iter(jax.random.split(key, 256))

    def dense(k_in, k_out):
        return {"w": jax.random.normal(next(keys), (k_in, k_out), jnp.float32) * INIT_STD,
                "b": jnp.zeros((k_out,), jnp.float32)}

    def ln():
        return {"g": jnp.ones((HIDDEN,), jnp.float32),
                "b": jnp.zeros((HIDDEN,), jnp.float32)}

    params = {
        "word_emb": jax.random.normal(next(keys), (VOCAB_SIZE, HIDDEN), jnp.float32) * INIT_STD,
        "pos_emb": jax.random.normal(next(keys), (MAX_POS, HIDDEN), jnp.float32) * INIT_STD,
        "type_emb": jax.random.normal(next(keys), (1, HIDDEN), jnp.float32) * INIT_STD,
        "emb_ln": ln(),
        "layers": [],
        "pooler": dense(HIDDEN, HIDDEN),
    }
    # RoBERTa zeroes the padding_idx embedding rows
    params["word_emb"] = params["word_emb"].at[PAD_IDX].set(0.0)
    params["pos_emb"] = params["pos_emb"].at[PAD_IDX].set(0.0)
    for _ in range(N_LAYERS):
        params["layers"].append({
            "q": dense(HIDDEN, HIDDEN), "k": dense(HIDDEN, HIDDEN), "v": dense(HIDDEN, HIDDEN),
            "attn_out": dense(HIDDEN, HIDDEN), "attn_ln": ln(),
            "ffn_in": dense(HIDDEN, INTERMEDIATE), "ffn_out": dense(INTERMEDIATE, HIDDEN),
            "ffn_ln": ln(),
        })
    return params


def build_fused_params(params):
    """One-time preprocessing (hoisted out of forward): stack/pack per-layer weights.

    Folds the 1/sqrt(head_dim) attention scale into the Q weights/bias, fuses Q/K/V into a
    single [H, 3H] matmul, packs [wqkv|wo|wf1] along lanes, and packs all small vectors
    (plus the embedding-LN gamma/beta) into one (L, NVEC, VEC_COLS) slab.
    """
    scale = 1.0 / math.sqrt(HEAD_DIM)
    w_in, wf2, vecs = [], [], []
    for lyr in params["layers"]:
        wqkv = jnp.concatenate([lyr["q"]["w"] * scale, lyr["k"]["w"], lyr["v"]["w"]], axis=1)
        w_in.append(jnp.concatenate([wqkv, lyr["attn_out"]["w"], lyr["ffn_in"]["w"]], axis=1))
        wf2.append(lyr["ffn_out"]["w"])
        v = jnp.zeros((NVEC, VEC_COLS), jnp.float32)
        bqkv = jnp.concatenate([lyr["q"]["b"] * scale, lyr["k"]["b"], lyr["v"]["b"]])
        v = v.at[0, :3 * HIDDEN].set(bqkv)
        v = v.at[1, :HIDDEN].set(lyr["attn_out"]["b"])
        v = v.at[2, :HIDDEN].set(lyr["attn_ln"]["g"])
        v = v.at[3, :HIDDEN].set(lyr["attn_ln"]["b"])
        v = v.at[4, :INTERMEDIATE].set(lyr["ffn_in"]["b"])
        v = v.at[5, :HIDDEN].set(lyr["ffn_out"]["b"])
        v = v.at[6, :HIDDEN].set(lyr["ffn_ln"]["g"])
        v = v.at[7, :HIDDEN].set(lyr["ffn_ln"]["b"])
        vecs.append(v)
    vecs = jnp.stack(vecs)
    # embedding LayerNorm params live in layer 0's spare row (read only at grid step 0)
    vecs = vecs.at[0, 8, :HIDDEN].set(params["emb_ln"]["g"])
    vecs = vecs.at[0, 8, HIDDEN:2 * HIDDEN].set(params["emb_ln"]["b"])
    return {
        "w_in": jnp.stack(w_in),          # (L, H, 3H+H+FF)
        "wf2": jnp.stack(wf2),            # (L, FF, H)
        "vecs": vecs,                     # (L, NVEC, VEC_COLS)
        "word_emb": params["word_emb"],
        "pos_emb": params["pos_emb"],
        "type_emb": params["type_emb"],
        "pooler_w": params["pooler"]["w"],
        "pooler_b": params["pooler"]["b"],
    }


# ---------------------------------- forward ----------------------------------

def pl_encoder_forward(fused, input_ids, attention_mask):
    """Mirrors RobertaModel(input_ids, attention_mask, output_hidden_states=True) at eval."""
    B, S = input_ids.shape

    # RoBERTa position ids: cumsum over non-pad tokens, offset by padding_idx
    not_pad = (input_ids != PAD_IDX).astype(jnp.int32)
    position_ids = jnp.cumsum(not_pad, axis=1) * not_pad + PAD_IDX
    token_type_ids = jnp.zeros_like(input_ids)

    emb = (jnp.take(fused["word_emb"], input_ids, axis=0)
           + jnp.take(fused["pos_emb"], position_ids, axis=0)
           + jnp.take(fused["type_emb"], token_type_ids, axis=0))
    x = emb.reshape(B * S, HIDDEN).astype(jnp.float32)
    # dropout: eval-mode identity

    # extended attention mask, finite negative, broadcast over query positions in-kernel
    bias3d = ((1.0 - attention_mask.astype(jnp.float32)) * MASK_NEG).reshape(B, 1, S)

    emb_hidden, layer_hidden = encoder_stack(x, bias3d, fused, batch=B, seq=S)

    hidden_states = (emb_hidden.reshape(B, S, HIDDEN),) + tuple(
        layer_hidden[i].reshape(B, S, HIDDEN) for i in range(N_LAYERS))
    last_hidden = hidden_states[-1]
    cls = last_hidden[:, 0, :]                                        # [B, H]
    # Pooler dense+tanh on a [B, H] matrix is pure launch overhead as a kernel -> plain JAX.
    pooled = jnp.tanh(cls @ fused["pooler_w"] + fused["pooler_b"])

    return {
        "last_hidden_state": last_hidden,
        "pooler_output": pooled,
        "hidden_states": hidden_states,
    }


if __name__ == "__main__":
    key = jax.random.PRNGKey(0)
    pkey, ikey = jax.random.split(key)
    params = init_params(pkey)
    fused = build_fused_params(params)        # one-time preprocessing, outside the jitted forward

    B, S = 2, 8
    input_ids = jax.random.randint(ikey, (B, S), 3, VOCAB_SIZE, dtype=jnp.int32)
    input_ids = input_ids.at[1, -2:].set(PAD_IDX)                  # pad tail of 2nd sequence
    attention_mask = (input_ids != PAD_IDX).astype(jnp.int32)

    forward = jax.jit(pl_encoder_forward)
    out = forward(fused, input_ids, attention_mask)
    jax.block_until_ready(out)

    assert out["last_hidden_state"].shape == (B, S, HIDDEN)
    assert out["pooler_output"].shape == (B, HIDDEN)
    assert len(out["hidden_states"]) == N_LAYERS + 1
    assert all(h.shape == (B, S, HIDDEN) for h in out["hidden_states"])
    assert bool(jnp.all(jnp.isfinite(out["last_hidden_state"])))
    assert bool(jnp.all(jnp.isfinite(out["pooler_output"])))
    print("KERNEL_OK")
</pallas_src>

<mosaic_0001>
module attributes {stable_mosaic.version = 11 : i64} {
  func.func @_encoder_stack_kernel(%arg0: i32, %arg1: memref<16x32xf32, #tpu.memory_space<vmem>>, %arg2: memref<2x1x8xf32, #tpu.memory_space<vmem>>, %arg3: memref<1x32x192xf32, #tpu.memory_space<vmem>>, %arg4: memref<1x64x32xf32, #tpu.memory_space<vmem>>, %arg5: memref<1x9x96xf32, #tpu.memory_space<vmem>>, %arg6: memref<16x32xf32, #tpu.memory_space<vmem>>, %arg7: memref<1x16x32xf32, #tpu.memory_space<vmem>>, %arg8: memref<16x32xf32, #tpu.memory_space<vmem>>) attributes {dimension_semantics = [#tpu.dimension_semantics<arbitrary>], iteration_bounds = array<i64: 2>, scalar_prefetch = 0 : i64, scratch_operands = 1 : i64, tpu.core_type = #tpu.core_type<tc>, window_params = [{pipeline_mode = #tpu.pipeline_mode<synchronous>, transform_indices = @transform_0, window_bounds = array<i64: 16, 32>}, {pipeline_mode = #tpu.pipeline_mode<synchronous>, transform_indices = @transform_1, window_bounds = array<i64: 2, 1, 8>}, {transform_indices = @transform_2, window_bounds = array<i64: 1, 32, 192>}, {transform_indices = @transform_3, window_bounds = array<i64: 1, 64, 32>}, {transform_indices = @transform_4, window_bounds = array<i64: 1, 9, 96>}, {pipeline_mode = #tpu.pipeline_mode<synchronous>, transform_indices = @transform_5, window_bounds = array<i64: 16, 32>}, {transform_indices = @transform_6, window_bounds = array<i64: 1, 16, 32>}]} {
    %c0_i32 = arith.constant 0 : i32
    %0 = arith.cmpi eq, %arg0, %c0_i32 : i32
    %1 = arith.extui %0 : i1 to i32
    %c0_i32_0 = arith.constant 0 : i32
    %2 = arith.cmpi ne, %1, %c0_i32_0 : i32
    scf.if %2 {
      %c0_96 = arith.constant 0 : index
      %c8 = arith.constant 8 : index
      %c0_97 = arith.constant 0 : index
      %261 = vector.load %arg5[%c0_96, %c8, %c0_97] : memref<1x9x96xf32, #tpu.memory_space<vmem>>, vector<1x1x32xf32>
      %262 = vector.shape_cast %261 : vector<1x1x32xf32> to vector<1x32xf32>
      %c0_98 = arith.constant 0 : index
      %c8_99 = arith.constant 8 : index
      %c32 = arith.constant 32 : index
      %263 = vector.load %arg5[%c0_98, %c8_99, %c32] : memref<1x9x96xf32, #tpu.memory_space<vmem>>, vector<1x1x32xf32>
      %264 = vector.shape_cast %263 : vector<1x1x32xf32> to vector<1x32xf32>
      %c0_100 = arith.constant 0 : index
      %c0_101 = arith.constant 0 : index
      %265 = vector.load %arg1[%c0_100, %c0_101] : memref<16x32xf32, #tpu.memory_space<vmem>>, vector<16x32xf32>
      %cst_102 = arith.constant dense<0.000000e+00> : vector<16xf32>
      %266 = vector.multi_reduction <add>, %265, %cst_102 [1] : vector<16x32xf32> to vector<16xf32>
      %267 = vector.shape_cast %266 : vector<16xf32> to vector<16x1xf32>
      %cst_103 = arith.constant 3.200000e+01 : f32
      %268 = vector.broadcast %cst_103 : f32 to vector<16x1xf32>
      %269 = arith.divf %267, %268 : vector<16x1xf32>
      %270 = vector.broadcast %269 : vector<16x1xf32> to vector<16x32xf32>
      %271 = arith.subf %265, %270 : vector<16x32xf32>
      %272 = arith.mulf %271, %271 : vector<16x32xf32>
      %cst_104 = arith.constant dense<0.000000e+00> : vector<16xf32>
      %273 = vector.multi_reduction <add>, %272, %cst_104 [1] : vector<16x32xf32> to vector<16xf32>
      %274 = vector.shape_cast %273 : vector<16xf32> to vector<16x1xf32>
      %cst_105 = arith.constant 3.200000e+01 : f32
      %275 = vector.broadcast %cst_105 : f32 to vector<16x1xf32>
      %276 = arith.divf %274, %275 : vector<16x1xf32>
      %cst_106 = arith.constant 9.99999974E-6 : f32
      %277 = vector.broadcast %cst_106 : f32 to vector<16x1xf32>
      %278 = arith.addf %276, %277 : vector<16x1xf32>
      %279 = math.rsqrt %278 : vector<16x1xf32>
      %280 = vector.broadcast %279 : vector<16x1xf32> to vector<16x32xf32>
      %281 = arith.mulf %271, %280 : vector<16x32xf32>
      %282 = vector.broadcast %262 : vector<1x32xf32> to vector<16x32xf32>
      %283 = arith.mulf %281, %282 : vector<16x32xf32>
      %284 = vector.broadcast %264 : vector<1x32xf32> to vector<16x32xf32>
      %285 = arith.addf %283, %284 : vector<16x32xf32>
      %c0_107 = arith.constant 0 : index
      %c0_108 = arith.constant 0 : index
      %286 = vector.load %arg8[%c0_107, %c0_108] : memref<16x32xf32, #tpu.memory_space<vmem>>, vector<16x32xf32>
      tpu.vector_store %arg8[%c0_107, %c0_108], %285 {strides = array<i32>} : memref<16x32xf32, #tpu.memory_space<vmem>>, vector<16x32xf32>,
      %c0_109 = arith.constant 0 : index
      %c0_110 = arith.constant 0 : index
      %287 = vector.load %arg6[%c0_109, %c0_110] : memref<16x32xf32, #tpu.memory_space<vmem>>, vector<16x32xf32>
      tpu.vector_store %arg6[%c0_109, %c0_110], %285 {strides = array<i32>} : memref<16x32xf32, #tpu.memory_space<vmem>>, vector<16x32xf32>,
    } else {
    }
    %c0 = arith.constant 0 : index
    %c0_1 = arith.constant 0 : index
    %3 = vector.load %arg8[%c0, %c0_1] : memref<16x32xf32, #tpu.memory_space<vmem>>, vector<16x32xf32>
    %c0_2 = arith.constant 0 : index
    %c0_3 = arith.constant 0 : index
    %c0_4 = arith.constant 0 : index
    %4 = vector.load %arg3[%c0_2, %c0_3, %c0_4] : memref<1x32x192xf32, #tpu.memory_space<vmem>>, vector<1x32x96xf32>
    %5 = vector.shape_cast %4 : vector<1x32x96xf32> to vector<32x96xf32>
    %c0_5 = arith.constant 0 : index
    %c0_6 = arith.constant 0 : index
    %c96 = arith.constant 96 : index
    %6 = vector.load %arg3[%c0_5, %c0_6, %c96] : memref<1x32x192xf32, #tpu.memory_space<vmem>>, vector<1x32x32xf32>
    %7 = vector.shape_cast %6 : vector<1x32x32xf32> to vector<32x32xf32>
    %c0_7 = arith.constant 0 : index
    %c0_8 = arith.constant 0 : index
    %c128 = arith.constant 128 : index
    %8 = vector.load %arg3[%c0_7, %c0_8, %c128] : memref<1x32x192xf32, #tpu.memory_space<vmem>>, vector<1x32x64xf32>
    %9 = vector.shape_cast %8 : vector<1x32x64xf32> to vector<32x64xf32>
    %c0_9 = arith.constant 0 : index
    %c0_10 = arith.constant 0 : index
    %c0_11 = arith.constant 0 : index
    %10 = vector.load %arg4[%c0_9, %c0_10, %c0_11] : memref<1x64x32xf32, #tpu.memory_space<vmem>>, vector<1x64x32xf32>
    %11 = vector.shape_cast %10 : vector<1x64x32xf32> to vector<64x32xf32>
    %c0_12 = arith.constant 0 : index
    %c0_13 = arith.constant 0 : index
    %c0_14 = arith.constant 0 : index
    %12 = vector.load %arg5[%c0_12, %c0_13, %c0_14] : memref<1x9x96xf32, #tpu.memory_space<vmem>>, vector<1x1x96xf32>
    %13 = vector.shape_cast %12 : vector<1x1x96xf32> to vector<1x96xf32>
    %c0_15 = arith.constant 0 : index
    %c1 = arith.constant 1 : index
    %c0_16 = arith.constant 0 : index
    %14 = vector.load %arg5[%c0_15, %c1, %c0_16] : memref<1x9x96xf32, #tpu.memory_space<vmem>>, vector<1x1x32xf32>
    %15 = vector.shape_cast %14 : vector<1x1x32xf32> to vector<1x32xf32>
    %c0_17 = arith.constant 0 : index
    %c2 = arith.constant 2 : index
    %c0_18 = arith.constant 0 : index
    %16 = vector.load %arg5[%c0_17, %c2, %c0_18] : memref<1x9x96xf32, #tpu.memory_space<vmem>>, vector<1x1x32xf32>
    %17 = vector.shape_cast %16 : vector<1x1x32xf32> to vector<1x32xf32>
    %c0_19 = arith.constant 0 : index
    %c3 = arith.constant 3 : index
    %c0_20 = arith.constant 0 : index
    %18 = vector.load %arg5[%c0_19, %c3, %c0_20] : memref<1x9x96xf32, #tpu.memory_space<vmem>>, vector<1x1x32xf32>
    %19 = vector.shape_cast %18 : vector<1x1x32xf32> to vector<1x32xf32>
    %c0_21 = arith.constant 0 : index
    %c4 = arith.constant 4 : index
    %c0_22 = arith.constant 0 : index
    %20 = vector.load %arg5[%c0_21, %c4, %c0_22] : memref<1x9x96xf32, #tpu.memory_space<vmem>>, vector<1x1x64xf32>
    %21 = vector.shape_cast %20 : vector<1x1x64xf32> to vector<1x64xf32>
    %c0_23 = arith.constant 0 : index
    %c5 = arith.constant 5 : index
    %c0_24 = arith.constant 0 : index
    %22 = vector.load %arg5[%c0_23, %c5, %c0_24] : memref<1x9x96xf32, #tpu.memory_space<vmem>>, vector<1x1x32xf32>
    %23 = vector.shape_cast %22 : vector<1x1x32xf32> to vector<1x32xf32>
    %c0_25 = arith.constant 0 : index
    %c6 = arith.constant 6 : index
    %c0_26 = arith.constant 0 : index
    %24 = vector.load %arg5[%c0_25, %c6, %c0_26] : memref<1x9x96xf32, #tpu.memory_space<vmem>>, vector<1x1x32xf32>
    %25 = vector.shape_cast %24 : vector<1x1x32xf32> to vector<1x32xf32>
    %c0_27 = arith.constant 0 : index
    %c7 = arith.constant 7 : index
    %c0_28 = arith.constant 0 : index
    %26 = vector.load %arg5[%c0_27, %c7, %c0_28] : memref<1x9x96xf32, #tpu.memory_space<vmem>>, vector<1x1x32xf32>
    %27 = vector.shape_cast %26 : vector<1x1x32xf32> to vector<1x32xf32>
    %cst = arith.constant dense<0.000000e+00> : vector<16x96xf32>
    %28 = tpu.matmul %3, %5, %cst {dimension_numbers = #tpu.dot_dimension_numbers<[1], [0], [0], [1], [0, 0, 1, 1], [], []>} : vector<16x32xf32>, vector<32x96xf32>, vector<16x96xf32> -> vector<16x96xf32>
    %29 = vector.broadcast %13 : vector<1x96xf32> to vector<16x96xf32>
    %30 = arith.addf %28, %29 : vector<16x96xf32>
    %c0_29 = arith.constant 0 : index
    %c0_30 = arith.constant 0 : index
    %c0_31 = arith.constant 0 : index
    %31 = vector.load %arg2[%c0_29, %c0_30, %c0_31] : memref<2x1x8xf32, #tpu.memory_space<vmem>>, vector<1x1x8xf32>
    %32 = vector.shape_cast %31 : vector<1x1x8xf32> to vector<1x8xf32>
    %33 = vector.extract_strided_slice %30 {offsets = [0, 0], sizes = [8, 8], strides = [1, 1]} : vector<16x96xf32> to vector<8x8xf32>
    %34 = vector.extract_strided_slice %30 {offsets = [0, 32], sizes = [8, 8], strides = [1, 1]} : vector<16x96xf32> to vector<8x8xf32>
    %35 = vector.extract_strided_slice %30 {offsets = [0, 64], sizes = [8, 8], strides = [1, 1]} : vector<16x96xf32> to vector<8x8xf32>
    %cst_32 = arith.constant dense<0.000000e+00> : vector<8x8xf32>
    %36 = tpu.matmul %33, %34, %cst_32 {dimension_numbers = #tpu.dot_dimension_numbers<[1], [1], [0], [0], [0, 0, 1, 0], [], []>} : vector<8x8xf32>, vector<8x8xf32>, vector<8x8xf32> -> vector<8x8xf32>
    %37 = vector.broadcast %32 : vector<1x8xf32> to vector<8x8xf32>
    %38 = arith.addf %36, %37 : vector<8x8xf32>
    %cst_33 = arith.constant dense<0xFF800000> : vector<8xf32>
    %39 = vector.multi_reduction <maximumf>, %38, %cst_33 [1] : vector<8x8xf32> to vector<8xf32>
    %40 = vector.shape_cast %39 : vector<8xf32> to vector<8x1xf32>
    %41 = vector.broadcast %40 : vector<8x1xf32> to vector<8x8xf32>
    %42 = arith.subf %38, %41 : vector<8x8xf32>
    %43 = math.exp %42 : vector<8x8xf32>
    %cst_34 = arith.constant dense<0.000000e+00> : vector<8xf32>
    %44 = vector.multi_reduction <add>, %43, %cst_34 [1] : vector<8x8xf32> to vector<8xf32>
    %45 = vector.shape_cast %44 : vector<8xf32> to vector<8x1xf32>
    %46 = tpu.reciprocal %45 {approx = true} : vector<8x1xf32> -> vector<8x1xf32>
    %47 = vector.broadcast %46 : vector<8x1xf32> to vector<8x8xf32>
    %48 = arith.mulf %43, %47 : vector<8x8xf32>
    %cst_35 = arith.constant dense<0.000000e+00> : vector<8x8xf32>
    %49 = tpu.matmul %48, %35, %cst_35 {dimension_numbers = #tpu.dot_dimension_numbers<[1], [0], [0], [1], [0, 0, 1, 1], [], []>} : vector<8x8xf32>, vector<8x8xf32>, vector<8x8xf32> -> vector<8x8xf32>
    %50 = vector.extract_strided_slice %7 {offsets = [0, 0], sizes = [8, 32], strides = [1, 1]} : vector<32x32xf32> to vector<8x32xf32>
    %cst_36 = arith.constant dense<0.000000e+00> : vector<8x32xf32>
    %51 = tpu.matmul %49, %50, %cst_36 {dimension_numbers = #tpu.dot_dimension_numbers<[1], [0], [0], [1], [0, 0, 1, 1], [], []>} : vector<8x8xf32>, vector<8x32xf32>, vector<8x32xf32> -> vector<8x32xf32>
    %52 = vector.extract_strided_slice %30 {offsets = [0, 8], sizes = [8, 8], strides = [1, 1]} : vector<16x96xf32> to vector<8x8xf32>
    %53 = vector.extract_strided_slice %30 {offsets = [0, 40], sizes = [8, 8], strides = [1, 1]} : vector<16x96xf32> to vector<8x8xf32>
    %54 = vector.extract_strided_slice %30 {offsets = [0, 72], sizes = [8, 8], strides = [1, 1]} : vector<16x96xf32> to vector<8x8xf32>
    %cst_37 = arith.constant dense<0.000000e+00> : vector<8x8xf32>
    %55 = tpu.matmul %52, %53, %cst_37 {dimension_numbers = #tpu.dot_dimension_numbers<[1], [1], [0], [0], [0, 0, 1, 0], [], []>} : vector<8x8xf32>, vector<8x8xf32>, vector<8x8xf32> -> vector<8x8xf32>
    %56 = vector.broadcast %32 : vector<1x8xf32> to vector<8x8xf32>
    %57 = arith.addf %55, %56 : vector<8x8xf32>
    %cst_38 = arith.constant dense<0xFF800000> : vector<8xf32>
    %58 = vector.multi_reduction <maximumf>, %57, %cst_38 [1] : vector<8x8xf32> to vector<8xf32>
    %59 = vector.shape_cast %58 : vector<8xf32> to vector<8x1xf32>
    %60 = vector.broadcast %59 : vector<8x1xf32> to vector<8x8xf32>
    %61 = arith.subf %57, %60 : vector<8x8xf32>
    %62 = math.exp %61 : vector<8x8xf32>
    %cst_39 = arith.constant dense<0.000000e+00> : vector<8xf32>
    %63 = vector.multi_reduction <add>, %62, %cst_39 [1] : vector<8x8xf32> to vector<8xf32>
    %64 = vector.shape_cast %63 : vector<8xf32> to vector<8x1xf32>
    %65 = tpu.reciprocal %64 {approx = true} : vector<8x1xf32> -> vector<8x1xf32>
    %66 = vector.broadcast %65 : vector<8x1xf32> to vector<8x8xf32>
    %67 = arith.mulf %62, %66 : vector<8x8xf32>
    %cst_40 = arith.constant dense<0.000000e+00> : vector<8x8xf32>
    %68 = tpu.matmul %67, %54, %cst_40 {dimension_numbers = #tpu.dot_dimension_numbers<[1], [0], [0], [1], [0, 0, 1, 1], [], []>} : vector<8x8xf32>, vector<8x8xf32>, vector<8x8xf32> -> vector<8x8xf32>
    %69 = vector.extract_strided_slice %7 {offsets = [8, 0], sizes = [8, 32], strides = [1, 1]} : vector<32x32xf32> to vector<8x32xf32>
    %cst_41 = arith.constant dense<0.000000e+00> : vector<8x32xf32>
    %70 = tpu.matmul %68, %69, %cst_41 {dimension_numbers = #tpu.dot_dimension_numbers<[1], [0], [0], [1], [0, 0, 1, 1], [], []>} : vector<8x8xf32>, vector<8x32xf32>, vector<8x32xf32> -> vector<8x32xf32>
    %71 = arith.addf %51, %70 : vector<8x32xf32>
    %72 = vector.extract_strided_slice %30 {offsets = [0, 16], sizes = [8, 8], strides = [1, 1]} : vector<16x96xf32> to vector<8x8xf32>
    %73 = vector.extract_strided_slice %30 {offsets = [0, 48], sizes = [8, 8], strides = [1, 1]} : vector<16x96xf32> to vector<8x8xf32>
    %74 = vector.extract_strided_slice %30 {offsets = [0, 80], sizes = [8, 8], strides = [1, 1]} : vector<16x96xf32> to vector<8x8xf32>
    %cst_42 = arith.constant dense<0.000000e+00> : vector<8x8xf32>
    %75 = tpu.matmul %72, %73, %cst_42 {dimension_numbers = #tpu.dot_dimension_numbers<[1], [1], [0], [0], [0, 0, 1, 0], [], []>} : vector<8x8xf32>, vector<8x8xf32>, vector<8x8xf32> -> vector<8x8xf32>
    %76 = vector.broadcast %32 : vector<1x8xf32> to vector<8x8xf32>
    %77 = arith.addf %75, %76 : vector<8x8xf32>
    %cst_43 = arith.constant dense<0xFF800000> : vector<8xf32>
    %78 = vector.multi_reduction <maximumf>, %77, %cst_43 [1] : vector<8x8xf32> to vector<8xf32>
    %79 = vector.shape_cast %78 : vector<8xf32> to vector<8x1xf32>
    %80 = vector.broadcast %79 : vector<8x1xf32> to vector<8x8xf32>
    %81 = arith.subf %77, %80 : vector<8x8xf32>
    %82 = math.exp %81 : vector<8x8xf32>
    %cst_44 = arith.constant dense<0.000000e+00> : vector<8xf32>
    %83 = vector.multi_reduction <add>, %82, %cst_44 [1] : vector<8x8xf32> to vector<8xf32>
    %84 = vector.shape_cast %83 : vector<8xf32> to vector<8x1xf32>
    %85 = tpu.reciprocal %84 {approx = true} : vector<8x1xf32> -> vector<8x1xf32>
    %86 = vector.broadcast %85 : vector<8x1xf32> to vector<8x8xf32>
    %87 = arith.mulf %82, %86 : vector<8x8xf32>
    %cst_45 = arith.constant dense<0.000000e+00> : vector<8x8xf32>
    %88 = tpu.matmul %87, %74, %cst_45 {dimension_numbers = #tpu.dot_dimension_numbers<[1], [0], [0], [1], [0, 0, 1, 1], [], []>} : vector<8x8xf32>, vector<8x8xf32>, vector<8x8xf32> -> vector<8x8xf32>
    %89 = vector.extract_strided_slice %7 {offsets = [16, 0], sizes = [8, 32], strides = [1, 1]} : vector<32x32xf32> to vector<8x32xf32>
    %cst_46 = arith.constant dense<0.000000e+00> : vector<8x32xf32>
    %90 = tpu.matmul %88, %89, %cst_46 {dimension_numbers = #tpu.dot_dimension_numbers<[1], [0], [0], [1], [0, 0, 1, 1], [], []>} : vector<8x8xf32>, vector<8x32xf32>, vector<8x32xf32> -> vector<8x32xf32>
    %91 = arith.addf %71, %90 : vector<8x32xf32>
    %92 = vector.extract_strided_slice %30 {offsets = [0, 24], sizes = [8, 8], strides = [1, 1]} : vector<16x96xf32> to vector<8x8xf32>
    %93 = vector.extract_strided_slice %30 {offsets = [0, 56], sizes = [8, 8], strides = [1, 1]} : vector<16x96xf32> to vector<8x8xf32>
    %94 = vector.extract_strided_slice %30 {offsets = [0, 88], sizes = [8, 8], strides = [1, 1]} : vector<16x96xf32> to vector<8x8xf32>
    %cst_47 = arith.constant dense<0.000000e+00> : vector<8x8xf32>
    %95 = tpu.matmul %92, %93, %cst_47 {dimension_numbers = #tpu.dot_dimension_numbers<[1], [1], [0], [0], [0, 0, 1, 0], [], []>} : vector<8x8xf32>, vector<8x8xf32>, vector<8x8xf32> -> vector<8x8xf32>
    %96 = vector.broadcast %32 : vector<1x8xf32> to vector<8x8xf32>
    %97 = arith.addf %95, %96 : vector<8x8xf32>
    %cst_48 = arith.constant dense<0xFF800000> : vector<8xf32>
    %98 = vector.multi_reduction <maximumf>, %97, %cst_48 [1] : vector<8x8xf32> to vector<8xf32>
    %99 = vector.shape_cast %98 : vector<8xf32> to vector<8x1xf32>
    %100 = vector.broadcast %99 : vector<8x1xf32> to vector<8x8xf32>
    %101 = arith.subf %97, %100 : vector<8x8xf32>
    %102 = math.exp %101 : vector<8x8xf32>
    %cst_49 = arith.constant dense<0.000000e+00> : vector<8xf32>
    %103 = vector.multi_reduction <add>, %102, %cst_49 [1] : vector<8x8xf32> to vector<8xf32>
    %104 = vector.shape_cast %103 : vector<8xf32> to vector<8x1xf32>
    %105 = tpu.reciprocal %104 {approx = true} : vector<8x1xf32> -> vector<8x1xf32>
    %106 = vector.broadcast %105 : vector<8x1xf32> to vector<8x8xf32>
    %107 = arith.mulf %102, %106 : vector<8x8xf32>
    %cst_50 = arith.constant dense<0.000000e+00> : vector<8x8xf32>
    %108 = tpu.matmul %107, %94, %cst_50 {dimension_numbers = #tpu.dot_dimension_numbers<[1], [0], [0], [1], [0, 0, 1, 1], [], []>} : vector<8x8xf32>, vector<8x8xf32>, vector<8x8xf32> -> vector<8x8xf32>
    %109 = vector.extract_strided_slice %7 {offsets = [24, 0], sizes = [8, 32], strides = [1, 1]} : vector<32x32xf32> to vector<8x32xf32>
    %cst_51 = arith.constant dense<0.000000e+00> : vector<8x32xf32>
    %110 = tpu.matmul %108, %109, %cst_51 {dimension_numbers = #tpu.dot_dimension_numbers<[1], [0], [0], [1], [0, 0, 1, 1], [], []>} : vector<8x8xf32>, vector<8x32xf32>, vector<8x32xf32> -> vector<8x32xf32>
    %111 = arith.addf %91, %110 : vector<8x32xf32>
    %c1_52 = arith.constant 1 : index
    %c0_53 = arith.constant 0 : index
    %c0_54 = arith.constant 0 : index
    %112 = vector.load %arg2[%c1_52, %c0_53, %c0_54] : memref<2x1x8xf32, #tpu.memory_space<vmem>>, vector<1x1x8xf32>
    %113 = vector.shape_cast %112 : vector<1x1x8xf32> to vector<1x8xf32>
    %114 = vector.extract_strided_slice %30 {offsets = [8, 0], sizes = [8, 8], strides = [1, 1]} : vector<16x96xf32> to vector<8x8xf32>
    %115 = vector.extract_strided_slice %30 {offsets = [8, 32], sizes = [8, 8], strides = [1, 1]} : vector<16x96xf32> to vector<8x8xf32>
    %116 = vector.extract_strided_slice %30 {offsets = [8, 64], sizes = [8, 8], strides = [1, 1]} : vector<16x96xf32> to vector<8x8xf32>
    %cst_55 = arith.constant dense<0.000000e+00> : vector<8x8xf32>
    %117 = tpu.matmul %114, %115, %cst_55 {dimension_numbers = #tpu.dot_dimension_numbers<[1], [1], [0], [0], [0, 0, 1, 0], [], []>} : vector<8x8xf32>, vector<8x8xf32>, vector<8x8xf32> -> vector<8x8xf32>
    %118 = vector.broadcast %113 : vector<1x8xf32> to vector<8x8xf32>
    %119 = arith.addf %117, %118 : vector<8x8xf32>
    %cst_56 = arith.constant dense<0xFF800000> : vector<8xf32>
    %120 = vector.multi_reduction <maximumf>, %119, %cst_56 [1] : vector<8x8xf32> to vector<8xf32>
    %121 = vector.shape_cast %120 : vector<8xf32> to vector<8x1xf32>
    %122 = vector.broadcast %121 : vector<8x1xf32> to vector<8x8xf32>
    %123 = arith.subf %119, %122 : vector<8x8xf32>
    %124 = math.exp %123 : vector<8x8xf32>
    %cst_57 = arith.constant dense<0.000000e+00> : vector<8xf32>
    %125 = vector.multi_reduction <add>, %124, %cst_57 [1] : vector<8x8xf32> to vector<8xf32>
    %126 = vector.shape_cast %125 : vector<8xf32> to vector<8x1xf32>
    %127 = tpu.reciprocal %126 {approx = true} : vector<8x1xf32> -> vector<8x1xf32>
    %128 = vector.broadcast %127 : vector<8x1xf32> to vector<8x8xf32>
    %129 = arith.mulf %124, %128 : vector<8x8xf32>
    %cst_58 = arith.constant dense<0.000000e+00> : vector<8x8xf32>
    %130 = tpu.matmul %129, %116, %cst_58 {dimension_numbers = #tpu.dot_dimension_numbers<[1], [0], [0], [1], [0, 0, 1, 1], [], []>} : vector<8x8xf32>, vector<8x8xf32>, vector<8x8xf32> -> vector<8x8xf32>
    %131 = vector.extract_strided_slice %7 {offsets = [0, 0], sizes = [8, 32], strides = [1, 1]} : vector<32x32xf32> to vector<8x32xf32>
    %cst_59 = arith.constant dense<0.000000e+00> : vector<8x32xf32>
    %132 = tpu.matmul %130, %131, %cst_59 {dimension_numbers = #tpu.dot_dimension_numbers<[1], [0], [0], [1], [0, 0, 1, 1], [], []>} : vector<8x8xf32>, vector<8x32xf32>, vector<8x32xf32> -> vector<8x32xf32>
    %133 = vector.extract_strided_slice %30 {offsets = [8, 8], sizes = [8, 8], strides = [1, 1]} : vector<16x96xf32> to vector<8x8xf32>
    %134 = vector.extract_strided_slice %30 {offsets = [8, 40], sizes = [8, 8], strides = [1, 1]} : vector<16x96xf32> to vector<8x8xf32>
    %135 = vector.extract_strided_slice %30 {offsets = [8, 72], sizes = [8, 8], strides = [1, 1]} : vector<16x96xf32> to vector<8x8xf32>
    %cst_60 = arith.constant dense<0.000000e+00> : vector<8x8xf32>
    %136 = tpu.matmul %133, %134, %cst_60 {dimension_numbers = #tpu.dot_dimension_numbers<[1], [1], [0], [0], [0, 0, 1, 0], [], []>} : vector<8x8xf32>, vector<8x8xf32>, vector<8x8xf32> -> vector<8x8xf32>
    %137 = vector.broadcast %113 : vector<1x8xf32> to vector<8x8xf32>
    %138 = arith.addf %136, %137 : vector<8x8xf32>
    %cst_61 = arith.constant dense<0xFF800000> : vector<8xf32>
    %139 = vector.multi_reduction <maximumf>, %138, %cst_61 [1] : vector<8x8xf32> to vector<8xf32>
    %140 = vector.shape_cast %139 : vector<8xf32> to vector<8x1xf32>
    %141 = vector.broadcast %140 : vector<8x1xf32> to vector<8x8xf32>
    %142 = arith.subf %138, %141 : vector<8x8xf32>
    %143 = math.exp %142 : vector<8x8xf32>
    %cst_62 = arith.constant dense<0.000000e+00> : vector<8xf32>
    %144 = vector.multi_reduction <add>, %143, %cst_62 [1] : vector<8x8xf32> to vector<8xf32>
    %145 = vector.shape_cast %144 : vector<8xf32> to vector<8x1xf32>
    %146 = tpu.reciprocal %145 {approx = true} : vector<8x1xf32> -> vector<8x1xf32>
    %147 = vector.broadcast %146 : vector<8x1xf32> to vector<8x8xf32>
    %148 = arith.mulf %143, %147 : vector<8x8xf32>
    %cst_63 = arith.constant dense<0.000000e+00> : vector<8x8xf32>
    %149 = tpu.matmul %148, %135, %cst_63 {dimension_numbers = #tpu.dot_dimension_numbers<[1], [0], [0], [1], [0, 0, 1, 1], [], []>} : vector<8x8xf32>, vector<8x8xf32>, vector<8x8xf32> -> vector<8x8xf32>
    %150 = vector.extract_strided_slice %7 {offsets = [8, 0], sizes = [8, 32], strides = [1, 1]} : vector<32x32xf32> to vector<8x32xf32>
    %cst_64 = arith.constant dense<0.000000e+00> : vector<8x32xf32>
    %151 = tpu.matmul %149, %150, %cst_64 {dimension_numbers = #tpu.dot_dimension_numbers<[1], [0], [0], [1], [0, 0, 1, 1], [], []>} : vector<8x8xf32>, vector<8x32xf32>, vector<8x32xf32> -> vector<8x32xf32>
    %152 = arith.addf %132, %151 : vector<8x32xf32>
    %153 = vector.extract_strided_slice %30 {offsets = [8, 16], sizes = [8, 8], strides = [1, 1]} : vector<16x96xf32> to vector<8x8xf32>
    %154 = vector.extract_strided_slice %30 {offsets = [8, 48], sizes = [8, 8], strides = [1, 1]} : vector<16x96xf32> to vector<8x8xf32>
    %155 = vector.extract_strided_slice %30 {offsets = [8, 80], sizes = [8, 8], strides = [1, 1]} : vector<16x96xf32> to vector<8x8xf32>
    %cst_65 = arith.constant dense<0.000000e+00> : vector<8x8xf32>
    %156 = tpu.matmul %153, %154, %cst_65 {dimension_numbers = #tpu.dot_dimension_numbers<[1], [1], [0], [0], [0, 0, 1, 0], [], []>} : vector<8x8xf32>, vector<8x8xf32>, vector<8x8xf32> -> vector<8x8xf32>
    %157 = vector.broadcast %113 : vector<1x8xf32> to vector<8x8xf32>
    %158 = arith.addf %156, %157 : vector<8x8xf32>
    %cst_66 = arith.constant dense<0xFF800000> : vector<8xf32>
    %159 = vector.multi_reduction <maximumf>, %158, %cst_66 [1] : vector<8x8xf32> to vector<8xf32>
    %160 = vector.shape_cast %159 : vector<8xf32> to vector<8x1xf32>
    %161 = vector.broadcast %160 : vector<8x1xf32> to vector<8x8xf32>
    %162 = arith.subf %158, %161 : vector<8x8xf32>
    %163 = math.exp %162 : vector<8x8xf32>
    %cst_67 = arith.constant dense<0.000000e+00> : vector<8xf32>
    %164 = vector.multi_reduction <add>, %163, %cst_67 [1] : vector<8x8xf32> to vector<8xf32>
    %165 = vector.shape_cast %164 : vector<8xf32> to vector<8x1xf32>
    %166 = tpu.reciprocal %165 {approx = true} : vector<8x1xf32> -> vector<8x1xf32>
    %167 = vector.broadcast %166 : vector<8x1xf32> to vector<8x8xf32>
    %168 = arith.mulf %163, %167 : vector<8x8xf32>
    %cst_68 = arith.constant dense<0.000000e+00> : vector<8x8xf32>
    %169 = tpu.matmul %168, %155, %cst_68 {dimension_numbers = #tpu.dot_dimension_numbers<[1], [0], [0], [1], [0, 0, 1, 1], [], []>} : vector<8x8xf32>, vector<8x8xf32>, vector<8x8xf32> -> vector<8x8xf32>
    %170 = vector.extract_strided_slice %7 {offsets = [16, 0], sizes = [8, 32], strides = [1, 1]} : vector<32x32xf32> to vector<8x32xf32>
    %cst_69 = arith.constant dense<0.000000e+00> : vector<8x32xf32>
    %171 = tpu.matmul %169, %170, %cst_69 {dimension_numbers = #tpu.dot_dimension_numbers<[1], [0], [0], [1], [0, 0, 1, 1], [], []>} : vector<8x8xf32>, vector<8x32xf32>, vector<8x32xf32> -> vector<8x32xf32>
    %172 = arith.addf %152, %171 : vector<8x32xf32>
    %173 = vector.extract_strided_slice %30 {offsets = [8, 24], sizes = [8, 8], strides = [1, 1]} : vector<16x96xf32> to vector<8x8xf32>
    %174 = vector.extract_strided_slice %30 {offsets = [8, 56], sizes = [8, 8], strides = [1, 1]} : vector<16x96xf32> to vector<8x8xf32>
    %175 = vector.extract_strided_slice %30 {offsets = [8, 88], sizes = [8, 8], strides = [1, 1]} : vector<16x96xf32> to vector<8x8xf32>
    %cst_70 = arith.constant dense<0.000000e+00> : vector<8x8xf32>
    %176 = tpu.matmul %173, %174, %cst_70 {dimension_numbers = #tpu.dot_dimension_numbers<[1], [1], [0], [0], [0, 0, 1, 0], [], []>} : vector<8x8xf32>, vector<8x8xf32>, vector<8x8xf32> -> vector<8x8xf32>
    %177 = vector.broadcast %113 : vector<1x8xf32> to vector<8x8xf32>
    %178 = arith.addf %176, %177 : vector<8x8xf32>
    %cst_71 = arith.constant dense<0xFF800000> : vector<8xf32>
    %179 = vector.multi_reduction <maximumf>, %178, %cst_71 [1] : vector<8x8xf32> to vector<8xf32>
    %180 = vector.shape_cast %179 : vector<8xf32> to vector<8x1xf32>
    %181 = vector.broadcast %180 : vector<8x1xf32> to vector<8x8xf32>
    %182 = arith.subf %178, %181 : vector<8x8xf32>
    %183 = math.exp %182 : vector<8x8xf32>
    %cst_72 = arith.constant dense<0.000000e+00> : vector<8xf32>
    %184 = vector.multi_reduction <add>, %183, %cst_72 [1] : vector<8x8xf32> to vector<8xf32>
    %185 = vector.shape_cast %184 : vector<8xf32> to vector<8x1xf32>
    %186 = tpu.reciprocal %185 {approx = true} : vector<8x1xf32> -> vector<8x1xf32>
    %187 = vector.broadcast %186 : vector<8x1xf32> to vector<8x8xf32>
    %188 = arith.mulf %183, %187 : vector<8x8xf32>
    %cst_73 = arith.constant dense<0.000000e+00> : vector<8x8xf32>
    %189 = tpu.matmul %188, %175, %cst_73 {dimension_numbers = #tpu.dot_dimension_numbers<[1], [0], [0], [1], [0, 0, 1, 1], [], []>} : vector<8x8xf32>, vector<8x8xf32>, vector<8x8xf32> -> vector<8x8xf32>
    %190 = vector.extract_strided_slice %7 {offsets = [24, 0], sizes = [8, 32], strides = [1, 1]} : vector<32x32xf32> to vector<8x32xf32>
    %cst_74 = arith.constant dense<0.000000e+00> : vector<8x32xf32>
    %191 = tpu.matmul %189, %190, %cst_74 {dimension_numbers = #tpu.dot_dimension_numbers<[1], [0], [0], [1], [0, 0, 1, 1], [], []>} : vector<8x8xf32>, vector<8x32xf32>, vector<8x32xf32> -> vector<8x32xf32>
    %192 = arith.addf %172, %191 : vector<8x32xf32>
    %193 = tpu.concatenate %111, %192 in 0 : vector<8x32xf32>, vector<8x32xf32> -> vector<16x32xf32>
    %194 = vector.broadcast %15 : vector<1x32xf32> to vector<16x32xf32>
    %195 = arith.addf %193, %194 : vector<16x32xf32>
    %196 = arith.addf %195, %3 : vector<16x32xf32>
    %cst_75 = arith.constant dense<0.000000e+00> : vector<16xf32>
    %197 = vector.multi_reduction <add>, %196, %cst_75 [1] : vector<16x32xf32> to vector<16xf32>
    %198 = vector.shape_cast %197 : vector<16xf32> to vector<16x1xf32>
    %cst_76 = arith.constant 3.200000e+01 : f32
    %199 = vector.broadcast %cst_76 : f32 to vector<16x1xf32>
    %200 = arith.divf %198, %199 : vector<16x1xf32>
    %201 = vector.broadcast %200 : vector<16x1xf32> to vector<16x32xf32>
    %202 = arith.subf %196, %201 : vector<16x32xf32>
    %203 = arith.mulf %202, %202 : vector<16x32xf32>
    %cst_77 = arith.constant dense<0.000000e+00> : vector<16xf32>
    %204 = vector.multi_reduction <add>, %203, %cst_77 [1] : vector<16x32xf32> to vector<16xf32>
    %205 = vector.shape_cast %204 : vector<16xf32> to vector<16x1xf32>
    %cst_78 = arith.constant 3.200000e+01 : f32
    %206 = vector.broadcast %cst_78 : f32 to vector<16x1xf32>
    %207 = arith.divf %205, %206 : vector<16x1xf32>
    %cst_79 = arith.constant 9.99999974E-6 : f32
    %208 = vector.broadcast %cst_79 : f32 to vector<16x1xf32>
    %209 = arith.addf %207, %208 : vector<16x1xf32>
    %210 = math.rsqrt %209 : vector<16x1xf32>
    %211 = vector.broadcast %210 : vector<16x1xf32> to vector<16x32xf32>
    %212 = arith.mulf %202, %211 : vector<16x32xf32>
    %213 = vector.broadcast %17 : vector<1x32xf32> to vector<16x32xf32>
    %214 = arith.mulf %212, %213 : vector<16x32xf32>
    %215 = vector.broadcast %19 : vector<1x32xf32> to vector<16x32xf32>
    %216 = arith.addf %214, %215 : vector<16x32xf32>
    %cst_80 = arith.constant dense<0.000000e+00> : vector<16x64xf32>
    %217 = tpu.matmul %216, %9, %cst_80 {dimension_numbers = #tpu.dot_dimension_numbers<[1], [0], [0], [1], [0, 0, 1, 1], [], []>} : vector<16x32xf32>, vector<32x64xf32>, vector<16x64xf32> -> vector<16x64xf32>
    %218 = vector.broadcast %21 : vector<1x64xf32> to vector<16x64xf32>
    %219 = arith.addf %217, %218 : vector<16x64xf32>
    %cst_81 = arith.constant 5.000000e-01 : f32
    %220 = vector.broadcast %cst_81 : f32 to vector<16x64xf32>
    %221 = arith.mulf %220, %219 : vector<16x64xf32>
    %cst_82 = arith.constant 4.471500e-02 : f32
    %222 = vector.broadcast %cst_82 : f32 to vector<16x64xf32>
    %223 = arith.mulf %222, %219 : vector<16x64xf32>
    %224 = arith.mulf %223, %219 : vector<16x64xf32>
    %225 = arith.mulf %224, %219 : vector<16x64xf32>
    %226 = arith.addf %219, %225 : vector<16x64xf32>
    %cst_83 = arith.constant 0.797884583 : f32
    %227 = vector.broadcast %cst_83 : f32 to vector<16x64xf32>
    %228 = arith.mulf %227, %226 : vector<16x64xf32>
    %229 = math.tanh %228 : vector<16x64xf32>
    %cst_84 = arith.constant 1.000000e+00 : f32
    %230 = vector.broadcast %cst_84 : f32 to vector<16x64xf32>
    %231 = arith.addf %230, %229 : vector<16x64xf32>
    %232 = arith.mulf %221, %231 : vector<16x64xf32>
    %cst_85 = arith.constant dense<0.000000e+00> : vector<16x32xf32>
    %233 = tpu.matmul %232, %11, %cst_85 {dimension_numbers = #tpu.dot_dimension_numbers<[1], [0], [0], [1], [0, 0, 1, 1], [], []>} : vector<16x64xf32>, vector<64x32xf32>, vector<16x32xf32> -> vector<16x32xf32>
    %234 = vector.broadcast %23 : vector<1x32xf32> to vector<16x32xf32>
    %235 = arith.addf %233, %234 : vector<16x32xf32>
    %236 = arith.addf %235, %216 : vector<16x32xf32>
    %cst_86 = arith.constant dense<0.000000e+00> : vector<16xf32>
    %237 = vector.multi_reduction <add>, %236, %cst_86 [1] : vector<16x32xf32> to vector<16xf32>
    %238 = vector.shape_cast %237 : vector<16xf32> to vector<16x1xf32>
    %cst_87 = arith.constant 3.200000e+01 : f32
    %239 = vector.broadcast %cst_87 : f32 to vector<16x1xf32>
    %240 = arith.divf %238, %239 : vector<16x1xf32>
    %241 = vector.broadcast %240 : vector<16x1xf32> to vector<16x32xf32>
    %242 = arith.subf %236, %241 : vector<16x32xf32>
    %243 = arith.mulf %242, %242 : vector<16x32xf32>
    %cst_88 = arith.constant dense<0.000000e+00> : vector<16xf32>
    %244 = vector.multi_reduction <add>, %243, %cst_88 [1] : vector<16x32xf32> to vector<16xf32>
    %245 = vector.shape_cast %244 : vector<16xf32> to vector<16x1xf32>
    %cst_89 = arith.constant 3.200000e+01 : f32
    %246 = vector.broadcast %cst_89 : f32 to vector<16x1xf32>
    %247 = arith.divf %245, %246 : vector<16x1xf32>
    %cst_90 = arith.constant 9.99999974E-6 : f32
    %248 = vector.broadcast %cst_90 : f32 to vector<16x1xf32>
    %249 = arith.addf %247, %248 : vector<16x1xf32>
    %250 = math.rsqrt %249 : vector<16x1xf32>
    %251 = vector.broadcast %250 : vector<16x1xf32> to vector<16x32xf32>
    %252 = arith.mulf %242, %251 : vector<16x32xf32>
    %253 = vector.broadcast %25 : vector<1x32xf32> to vector<16x32xf32>
    %254 = arith.mulf %252, %253 : vector<16x32xf32>
    %255 = vector.broadcast %27 : vector<1x32xf32> to vector<16x32xf32>
    %256 = arith.addf %254, %255 : vector<16x32xf32>
    %c0_91 = arith.constant 0 : index
    %c0_92 = arith.constant 0 : index
    %257 = vector.load %arg8[%c0_91, %c0_92] : memref<16x32xf32, #tpu.memory_space<vmem>>, vector<16x32xf32>
    tpu.vector_store %arg8[%c0_91, %c0_92], %256 {strides = array<i32>} : memref<16x32xf32, #tpu.memory_space<vmem>>, vector<16x32xf32>,
    %c0_93 = arith.constant 0 : index
    %c0_94 = arith.constant 0 : index
    %c0_95 = arith.constant 0 : index
    %258 = vector.load %arg7[%c0_93, %c0_94, %c0_95] : memref<1x16x32xf32, #tpu.memory_space<vmem>>, vector<1x16x32xf32>
    %259 = vector.shape_cast %258 : vector<1x16x32xf32> to vector<16x32xf32>
    %260 = vector.shape_cast %256 : vector<16x32xf32> to vector<1x16x32xf32>
    tpu.vector_store %arg7[%c0_93, %c0_94, %c0_95], %260 {strides = array<i32>} : memref<1x16x32xf32, #tpu.memory_space<vmem>>, vector<1x16x32xf32>,
    return
  }
  func.func @transform_0(%arg0: i32) -> (i32, i32) {
    %c0_i32 = arith.constant 0 : i32
    %c0_i32_0 = arith.constant 0 : i32
    %c0_i32_1 = arith.constant 0 : i32
    return %c0_i32, %c0_i32_0 : i32, i32
  }
  func.func @transform_1(%arg0: i32) -> (i32, i32, i32) {
    %c0_i32 = arith.constant 0 : i32
    %c0_i32_0 = arith.constant 0 : i32
    %c0_i32_1 = arith.constant 0 : i32
    %c0_i32_2 = arith.constant 0 : i32
    return %c0_i32, %c0_i32_0, %c0_i32_1 : i32, i32, i32
  }
  func.func @transform_2(%arg0: i32) -> (i32, i32, i32) {
    %c0_i32 = arith.constant 0 : i32
    %c0_i32_0 = arith.constant 0 : i32
    %c0_i32_1 = arith.constant 0 : i32
    return %arg0, %c0_i32, %c0_i32_0 : i32, i32, i32
  }
  func.func @transform_3(%arg0: i32) -> (i32, i32, i32) {
    %c0_i32 = arith.constant 0 : i32
    %c0_i32_0 = arith.constant 0 : i32
    %c0_i32_1 = arith.constant 0 : i32
    return %arg0, %c0_i32, %c0_i32_0 : i32, i32, i32
  }
  func.func @transform_4(%arg0: i32) -> (i32, i32, i32) {
    %c0_i32 = arith.constant 0 : i32
    %c0_i32_0 = arith.constant 0 : i32
    %c0_i32_1 = arith.constant 0 : i32
    return %arg0, %c0_i32, %c0_i32_0 : i32, i32, i32
  }
  func.func @transform_5(%arg0: i32) -> (i32, i32) {
    %c0_i32 = arith.constant 0 : i32
    %c0_i32_0 = arith.constant 0 : i32
    %c0_i32_1 = arith.constant 0 : i32
    return %c0_i32, %c0_i32_0 : i32, i32
  }
  func.func @transform_6(%arg0: i32) -> (i32, i32, i32) {
    %c0_i32 = arith.constant 0 : i32
    %c0_i32_0 = arith.constant 0 : i32
    %c0_i32_1 = arith.constant 0 : i32
    return %arg0, %c0_i32, %c0_i32_0 : i32, i32, i32
  }
}

</mosaic_0001>

<bundles_post_ra>
// kernel: pl_encoder_forward.1
= control target key start
LH: loop header
LB: loop body
LE: loop exit
PB: predicated region body
PF: predicated region fallthrough
CT: control target
= control target key end

     0   :  { %12 = vsyncpa [#allocation4], 0  ;;  %s3283_s21 = smov 0   ;;  %s3635_s0 = inlined_call_operand.vmem [shape: f32[16,32], index: 0, kind: input, shape index: {}]   ;;  %s3636_s1 = inlined_call_operand.vmem [shape: f32[2,1,8], index: 1, kind: input, shape index: {}]   ;;  %s3637_s2 = inlined_call_operand.vmem [shape: f32[2,32,192], index: 2, kind: input, shape index: {}]   ;;  %s3638_s3 = inlined_call_operand.vmem [shape: f32[2,64,32], index: 3, kind: input, shape index: {}]   ;;  %s3639_s4 = inlined_call_operand.vmem [shape: f32[2,9,96], index: 4, kind: input, shape index: {}]   ;;  %s3640_s5 = inlined_call_operand.hbm [shape: f32[16,32], index: 5, kind: output, shape index: {0}]   ;;  %s3641_s6 = inlined_call_operand.vmem [shape: f32[2,16,32], index: 6, kind: output, shape index: {1}]  }
   0x1 LB: > { %s3289_s22 = sadd.s32 4294967295, %s3228_s21   ;;  %p2781_p0 = scmp.ge.s32.totalorder %s3228_s21, 1  ;;  %s3228_s21 = sphi %s3283_s21, %s18_s21  }
   0x2   : > { %p231_p1 = scmp.lt.s32.totalorder %s3228_s21, 3 }
   0x4   : > { %p232_p2 = pnand %p2781_p0, %p231_p1 }
   0x5   : > { %p271_p3 = scmp.lt.s32.totalorder (!%p232_p2), %s3289_s22, 1  ;;  %p2790_p4 = scmp.ne.s32.totalorder (!%p232_p2), %s3289_s22, 0 }
   0x6   : > { %235 = sbr.rel (%p232_p2) target bundleno = 5818 (0x16ba), region = 40 }
   0xd   : > { %s272_s23 = scalar_select %p271_p3, %s3289_s22, 1 }
   0xe   : > { %294 = sbr.rel (%p2790_p4) target bundleno = 333 (0x14d), region = 44  ;;  %v296_v0 = vld [vmem:[%s3635_s0] sm:$0xff] (!%p2790_p4)  ;;  %vm298_vm0 = vcmask (!%p2790_p4), 261120   ;;  %v297_v1 = vld [vmem:[%s3635_s0 + $0x8] sm:$0xff] (!%p2790_p4)  ;;  %s3230_s18 = smov (!%p2790_p4), 96  }
   0xf   : > { %s2845_s24 = sshll.u32 %s272_s23, 6  ;;  %s2847_s25 = sshll.u32 %s272_s23, 4  ;;  %v299_v2 = vsel (!%p2790_p4), %vm298_vm0, %v296_v0, 0.0  ;;  %v302_v3 = vsel (!%p2790_p4), %vm298_vm0, %v297_v1, 0.0 }
  0x10   : > { %s3298_s28 = scalar_lea.vmem %s3637_s2, %s2845_s24  ;;  %s3303_s7 = scalar_lea.vmem %s3638_s3, %s2845_s24  ;;  %300 = vadd.xlane.f32.xlu0 (!%p2790_p4), %v299_v2 }
  0x11   : > { %s3308_s10 = scalar_lea.vmem %s3639_s4, %s2847_s25  ;;  %s3313_s13 = scalar_lea.vmem %s3641_s6, %s2847_s25 }
  0x12   : > { %v2791_v4 = vld [vmem:[%s3308_s10 + $0x8] ss:$0 sm:$0xff] (!%p2790_p4) }
  0x14   : > { %303 = vadd.xlane.f32.xlu0 (!%p2790_p4), %v302_v3 }
  0x2a   : > { %333 = vrot.lane.b32.xlu0 %v2791_v4, %s3230_s18 }
  0x9d   : > { %v301_v5 = vpop.xlane.xlu0 %300 }
  0x9e   : > { %v306_v6 = vmul.f32 0.03125, %v301_v5 }
  0xa0   : > { %v308_v7 = vsub.f32 %v296_v0, %v306_v6 }
  0xa1   : > { %v304_v8 = vpop.xlane.xlu0 %303 }
  0xa2   : > { %v307_v9 = vmul.f32 0.03125, %v304_v8  ;;  %v310_v10 = vmul.f32 %v308_v7, %v308_v7 }
  0xa4   : > { %v309_v11 = vsub.f32 %v297_v1, %v307_v9  ;;  %v312_v12 = vsel %vm298_vm0, %v310_v10, 0.0 }
  0xa5   : > { %313 = vadd.xlane.f32.xlu1 %v312_v12  ;;  %v334_v23 = vpop.permute.xlu0 %333 }
  0xa6   : > { %v311_v13 = vmul.f32 %v309_v11, %v309_v11 }
  0xa8   : > { %v315_v14 = vsel %vm298_vm0, %v311_v13, 0.0 }
  0xa9   : > { %316 = vadd.xlane.f32.xlu1 %v315_v14 }
 0x132   : > { %v314_v15 = vpop.xlane.xlu1 %313 }
 0x133   : > { %v318_v16 = vmul.f32 0.03125, %v314_v15 }
 0x135   : > { %v320_v17 = vadd.f32 1e-05, %v318_v16 }
 0x136   : > { %v317_v18 = vpop.xlane.xlu1 %316 }
 0x137   : > { %3144 = vrsqrt.f32 %v320_v17  ;;  %v319_v19 = vmul.f32 0.03125, %v317_v18 }
 0x139   : > { %v321_v20 = vadd.f32 1e-05, %v319_v19 }
 0x13b   : > { %3146 = vrsqrt.f32 %v321_v20 }
 0x141   : > { %v3145_v21 = vpop.eup %3144 }
 0x142   : > { %v324_v22 = vmul.f32 %v3145_v21, %v308_v7 }
 0x144   : > { %v330_v24 = vmul.f32 %v2791_v4, %v324_v22 }
 0x145   : > { %v3147_v25 = vpop.eup %3146 }
 0x146   : > { %v325_v26 = vmul.f32 %v3147_v25, %v309_v11  ;;  %v336_v27 = vadd.f32 %v334_v23, %v330_v24 }
 0x148   : > { %v331_v28 = vmul.f32 %v2791_v4, %v325_v26  ;;  %338 = vst.msk [vmem:[#allocation2] sm:$0xff] %vm298_vm0, %v336_v27  ;;  %340 = vst.msk [vmem:[#allocation3] sm:$0xff] %vm298_vm0, %v336_v27 }
 0x14a   : > { %v337_v29 = vadd.f32 %v334_v23, %v331_v28 }
 0x14c   : > { %339 = vst.msk [vmem:[#allocation2 + $0x8] sm:$0xff] %vm298_vm0, %v337_v29  ;;  %341 = vst.msk [vmem:[#allocation3 + $0x8] sm:$0xff] %vm298_vm0, %v337_v29 }
 0x14d PF: > { %v3332_v30 = vld [vmem:[%s3298_s28] sm:$0xff]  ;;  %v3335_v31 = vld [vmem:[%s3298_s28 + $0x10] sm:$0xff]  ;;  %vm372_vm1 = vcmask 261120   ;;  %v3231_v38 = vmov 0.0   ;;  %vm3232_vm2 = vmmov 0   ;;  %s3233_s19 = smov 120  }
 0x14e   : > { %v3338_v32 = vld [vmem:[%s3298_s28 + $0x20] sm:$0xff]  ;;  %v3080_v33 = vpack.c.bf16 %v3335_v31, %v3332_v30  ;;  %v3343_v34 = vld [vmem:[%s3298_s28 + $0x30] sm:$0xff]  ;;  %2935 = vmatprep.subr.mxu1 %v3231_v38  ;;  %2937 = vmatprep.mubr.msk.f32.mxu1 %vm3232_vm2, %v3231_v38  ;;  %s3234_s20 = smov 96   ;;  %s3235_s23 = smov 88   ;;  %vm464_vm3 = vcmask 64512   ;;  %vm2546_vm4 = vcmask 523264  }
 0x14f   : > { %v3345_v35 = vld [vmem:[#allocation2] sm:$0xff]  ;;  %v3084_v36 = vpack.c.bf16 %v3343_v34, %v3338_v32  ;;  %s3236_s26 = smov 56   ;;  %s3237_s27 = smov 64  }
 0x150   : > { %2927 = vmatprep.mubr.msk.f32.mxu0 %vm372_vm1, %v3345_v35  ;;  %3081 = vmatprep.subr.bf16.mxu0 %v3080_v33  ;;  %v2792_v39 = vld [vmem:[%s3308_s10] ss:$0 sm:$0xff]  ;;  %s3238_s29 = smov 32   ;;  %s3239_s30 = smov 80  }
 0x151   : > { %3083 = vmatpush3.bf16.msra.mxu0 %v3080_v33  ;;  %v3386_v47 = vld [vmem:[%s3636_s1] ss:$0 sm:$0xff]  ;;  %s3240_s8 = smov 112   ;;  %s3241_s9 = smov 48  }
 0x152   : > { %3085 = vmatprep.subr.bf16.mxu0 %v3084_v36  ;;  %s3242_s11 = smov 72   ;;  %s3243_s12 = smov 104  }
 0x153   : > { %v3351_v37 = vld [vmem:[#allocation2 + $0x8] sm:$0xff]  ;;  %s3244_s14 = smov 40   ;;  %p3116_p5 = scmp.eq.s32.totalorder %s3289_s22, 1 }
 0x155   : > { %3087 = vmatpush3.bf16.msra.mxu0 %v3084_v36 }
 0x156   : > { %2930 = vmatprep.subr.mxu0 %v3231_v38 }
 0x158   : > { %2928 = vmatmul.mubr.msk.f32.vlgmr.msra.gmra.mrb[0].mxu0 %vm372_vm1, %v3351_v37 }
 0x159   : > { %2932 = vmatprep.mubr.msk.f32.mxu0 %vm3232_vm2, %v3231_v38 }
 0x22b   : > { %v2929_v40 = vpop.f32.mrb[0].mxu0 }
 0x22c   : > { %v3362_v41 = vadd.f32 %v2929_v40, %v2792_v39  ;;  %v445_v42 = vpop.f32.mrb[1].mxu0 }
 0x22d   : > { %v3364_v43 = vadd.f32 %v2792_v39, %v445_v42 }
 0x22f   : > { %626 = vrot.lane.b32.xlu1 %v3364_v43, %s3233_s19  ;;  %462 = vrot.lane.b32.xlu0 %v3364_v43, %s3234_s20 }
 0x233   : > { %628 = vrot.lane.b32.xlu0 %v3364_v43, %s3235_s23 }
 0x2a1   : > { %v463_v44 = vpop.permute.xlu0 %462  ;;  %v627_v46 = vpop.permute.xlu1 %626 }
 0x2a2   : > { %2931 = vmatpush3.xpose.msk.msra.mxu0 %vm464_vm3, %v463_v44 }
 0x2a3   : > { %2940 = vmatprep.subr.mxu0 %v3231_v38 }
 0x2a5   : > { %2933 = vmatmul.mubr.msk.f32.vlgmr.msra.gmra.mrb[2].mxu0 %vm464_vm3, %v3364_v43  ;;  %v629_v45 = vpop.permute.xlu0 %628 }
 0x2a6   : > { %2941 = vmatpush3.xpose.msk.msra.mxu0 %vm464_vm3, %v629_v45  ;;  %2942 = vmatprep.mubr.msk.f32.mxu0 %vm3232_vm2, %v3231_v38 }
 0x2a7   : > { %2950 = vmatprep.subr.mxu0 %v3231_v38 }
 0x2a9   : > { %2943 = vmatmul.mubr.msk.f32.vlgmr.msra.gmra.mrb[4].mxu0 %vm464_vm3, %v627_v46 }
 0x2aa   : > { %2952 = vmatprep.mubr.msk.f32.mxu0 %vm3232_vm2, %v3231_v38 }
 0x378   : > { %v535_v48 = vpop.f32.mrb[2].mxu0 }
 0x379   : > { %v536_v49 = vadd.f32 %v3386_v47, %v535_v48  ;;  %v2934_v50 = vpop.f32.mrb[3].mxu0 }
 0x37b   : > { %v539_v51 = vsel %vm464_vm3, %v536_v49, -inf }
 0x37c   : > { %540 = vmax.xlane.f32.xlu1 %v539_v51  ;;  %v700_v52 = vpop.f32.mrb[4].mxu0 }
 0x37d   : > { %v701_v53 = vadd.f32 %v3386_v47, %v700_v52  ;;  %v2944_v54 = vpop.f32.mrb[5].mxu0 }
 0x37f   : > { %v704_v55 = vsel %vm464_vm3, %v701_v53, -inf }
 0x380   : > { %705 = vmax.xlane.f32.xlu0 %v704_v55 }
 0x409   : > { %v541_v56 = vpop.xlane.xlu1 %540 }
 0x40a   : > { %v542_v57 = vsub.f32 %v536_v49, %v541_v56 }
 0x40c   : > { %v543_v58 = vmul.f32 1.442695, %v542_v57 }
 0x40d   : > { %v706_v59 = vpop.xlane.xlu0 %705 }
 0x40e   : > { %3148 = vpow2.f32 %v543_v58  ;;  %v707_v60 = vsub.f32 %v701_v53, %v706_v59 }
 0x410   : > { %v708_v61 = vmul.f32 1.442695, %v707_v60 }
 0x412   : > { %3150 = vpow2.f32 %v708_v61 }
 0x418   : > { %v3149_v62 = vpop.eup %3148 }
 0x419   : > { %v545_v63 = vsel %vm464_vm3, %v3149_v62, 0.0 }
 0x41a   : > { %546 = vadd.xlane.f32.xlu0 %v545_v63 }
 0x41c   : > { %v3151_v0 = vpop.eup %3150 }
 0x41d   : > { %v710_v1 = vsel %vm464_vm3, %v3151_v0, 0.0 }
 0x41e   : > { %711 = vadd.xlane.f32.xlu1 %v710_v1 }
 0x42f   : > { %715 = vrot.lane.b32.xlu1 %v3364_v43, %s3236_s26 }
 0x430   : > { %550 = vrot.lane.b32.xlu0 %v3364_v43, %s3237_s27 }
 0x433   : > { %792 = vrot.lane.b32.xlu1 %v3335_v31, %s3238_s29 }
 0x434   : > { %947 = vrot.lane.b32.xlu0 %v3364_v43, %s3239_s30 }
 0x437   : > { %945 = vrot.lane.b32.xlu1 %v3364_v43, %s3240_s8 }
 0x43b   : > { %1034 = vrot.lane.b32.xlu1 %v3364_v43, %s3241_s9 }
 0x4a7   : > { %v547_v2 = vpop.xlane.xlu0 %546 }
 0x4a8   : > { %3152 = vrcp.f32 %v547_v2 }
 0x4ab   : > { %v712_v3 = vpop.xlane.xlu1 %711  ;;  %v551_v4 = vpop.permute.xlu0 %550 }
 0x4ac   : > { %3154 = vrcp.f32 %v712_v3  ;;  %2936 = vmatpush3.msra.mxu1 %v551_v4  ;;  %v3491_v3 = vld [vmem:[%s3636_s1 + $0x1] ss:$0 sm:$0xff] }
 0x4ad   : > { %2945 = vmatprep.subr.mxu1 %v3231_v38 }
 0x4af   : > { %v716_v5 = vpop.permute.xlu1 %715  ;;  %v948_v14 = vpop.permute.xlu0 %947 }
 0x4b2   : > { %v3153_v6 = vpop.eup %3152 }
 0x4b3   : > { %v3407_v7 = vpop.permute.xlu1 %792  ;;  %v549_v8 = vmul.f32 %v3153_v6, %v3149_v62 }
 0x4b4   : > { %2951 = vmatpush3.msra.mxu0 %v3407_v7 }
 0x4b5   : > { %2938 = vmatmul.mubr.msk.f32.vlgmr.msra.gmra.mrb[0].mxu1 %vm464_vm3, %v549_v8  ;;  %2960 = vmatprep.subr.mxu0 %v3231_v38 }
 0x4b6   : > { %v3155_v9 = vpop.eup %3154  ;;  %2946 = vmatpush3.msra.mxu1 %v716_v5  ;;  %2947 = vmatprep.mubr.msk.f32.mxu1 %vm3232_vm2, %v3231_v38 }
 0x4b7   : > { %v714_v10 = vmul.f32 %v3155_v9, %v3151_v0  ;;  %2955 = vmatprep.subr.mxu1 %v3231_v38  ;;  %v946_v16 = vpop.permute.xlu1 %945 }
 0x4b9   : > { %2948 = vmatmul.mubr.msk.f32.vlgmr.msra.gmra.mrb[2].mxu1 %vm464_vm3, %v714_v10 }
 0x4ba   : > { %2957 = vmatprep.mubr.msk.f32.mxu1 %vm3232_vm2, %v3231_v38 }
 0x4bb   : > { %v1035_v27 = vpop.permute.xlu1 %1034 }
 0x588   : > { %v622_v11 = vpop.f32.mrb[0].mxu1 }
 0x589   : > { %v2939_v12 = vpop.f32.mrb[1].mxu1 }
 0x58c   : > { %v787_v13 = vpop.f32.mrb[2].mxu1 }
 0x58d   : > { %v2949_v15 = vpop.f32.mrb[3].mxu1  ;;  %2953 = vmatmul.mubr.msk.f32.vlgmr.msra.gmra.mrb[6].mxu0 %vm464_vm3, %v787_v13 }
 0x58e   : > { %2961 = vmatpush3.xpose.msk.msra.mxu0 %vm464_vm3, %v948_v14  ;;  %2962 = vmatprep.mubr.msk.f32.mxu0 %vm3232_vm2, %v3231_v38 }
 0x58f   : > { %2970 = vmatprep.subr.mxu0 %v3231_v38 }
 0x591   : > { %2963 = vmatmul.mubr.msk.f32.vlgmr.msra.gmra.mrb[8].mxu0 %vm464_vm3, %v946_v16 }
 0x592   : > { %2972 = vmatprep.mubr.msk.f32.mxu0 %vm3232_vm2, %v3231_v38 }
 0x660   : > { %v864_v17 = vpop.f32.mrb[6].mxu0 }
 0x661   : > { %v2954_v18 = vpop.f32.mrb[7].mxu0 }
 0x664   : > { %v1019_v19 = vpop.f32.mrb[8].mxu0 }
 0x665   : > { %v1020_v20 = vadd.f32 %v3386_v47, %v1019_v19  ;;  %v2964_v21 = vpop.f32.mrb[9].mxu0 }
 0x667   : > { %v1023_v22 = vsel %vm464_vm3, %v1020_v20, -inf }
 0x668   : > { %1024 = vmax.xlane.f32.xlu0 %v1023_v22 }
 0x67e   : > { %869 = vrot.lane.b32.xlu0 %v3332_v30, %s3238_s29 }
 0x682   : > { %1190 = vrot.lane.b32.xlu0 %v3364_v43, %s3242_s11 }
 0x6f5   : > { %v1025_v23 = vpop.xlane.xlu0 %1024 }
 0x6f6   : > { %v1026_v24 = vsub.f32 %v1020_v20, %v1025_v23 }
 0x6f8   : > { %v1027_v25 = vmul.f32 1.442695, %v1026_v24 }
 0x6f9   : > { %v3432_v26 = vpop.permute.xlu0 %869 }
 0x6fa   : > { %3156 = vpow2.f32 %v1027_v25  ;;  %2956 = vmatpush3.msra.mxu1 %v3432_v26 }
 0x6fb   : > { %2958 = vmatmul.mubr.msk.f32.vlgmr.msra.gmra.mrb[4].mxu1 %vm464_vm3, %v622_v11  ;;  %2965 = vmatprep.subr.mxu1 %v3231_v38 }
 0x6fc   : > { %2966 = vmatpush3.msra.mxu1 %v1035_v27  ;;  %2967 = vmatprep.mubr.msk.f32.mxu1 %vm3232_vm2, %v3231_v38 }
 0x6fd   : > { %2975 = vmatprep.subr.mxu1 %v3231_v38  ;;  %v1191_v36 = vpop.permute.xlu0 %1190 }
 0x704   : > { %v3157_v28 = vpop.eup %3156 }
 0x705   : > { %v1029_v29 = vsel %vm464_vm3, %v3157_v28, 0.0 }
 0x706   : > { %1030 = vadd.xlane.f32.xlu1 %v1029_v29 }
 0x717   : > { %1188 = vrot.lane.b32.xlu1 %v3364_v43, %s3243_s12 }
 0x71b   : > { %1277 = vrot.lane.b32.xlu1 %v3364_v43, %s3244_s14 }
 0x793   : > { %v1031_v30 = vpop.xlane.xlu1 %1030 }
 0x794   : > { %3158 = vrcp.f32 %v1031_v30 }
 0x797   : > { %v1189_v39 = vpop.permute.xlu1 %1188 }
 0x79e   : > { %v3159_v31 = vpop.eup %3158 }
 0x79f   : > { %v1033_v33 = vmul.f32 %v3159_v31, %v3157_v28 }
 0x7a1   : > { %2968 = vmatmul.mubr.msk.f32.vlgmr.msra.gmra.mrb[6].mxu1 %vm464_vm3, %v1033_v33 }
 0x7a2   : > { %2976 = vmatpush3.xpose.msk.msra.mxu1 %vm464_vm3, %v1191_v36  ;;  %2977 = vmatprep.mubr.msk.f32.mxu1 %vm3232_vm2, %v3231_v38 }
 0x7a3   : > { %2985 = vmatprep.subr.mxu1 %v3231_v38 }
 0x7a5   : > { %2978 = vmatmul.mubr.msk.f32.vlgmr.msra.gmra.mrb[8].mxu1 %vm464_vm3, %v1189_v39 }
 0x7a6   : > { %2987 = vmatprep.mubr.msk.f32.mxu1 %vm3232_vm2, %v3231_v38 }
 0x7ce   : > { %v941_v40 = vpop.f32.mrb[4].mxu1 }
 0x7cf   : > { %v942_v42 = vadd.f32 %v941_v40, %v864_v17  ;;  %v2959_v43 = vpop.f32.mrb[5].mxu1 }
 0x874   : > { %v1106_v44 = vpop.f32.mrb[6].mxu1 }
 0x875   : > { %v2969_v45 = vpop.f32.mrb[7].mxu1 }
 0x878   : > { %v1262_v46 = vpop.f32.mrb[8].mxu1 }
 0x879   : > { %v1263_v48 = vadd.f32 %v3386_v47, %v1262_v46  ;;  %v2979_v49 = vpop.f32.mrb[9].mxu1  ;;  %v1278_v47 = vpop.permute.xlu1 %1277 }
 0x87b   : > { %v1266_v50 = vsel %vm464_vm3, %v1263_v48, -inf }
 0x87c   : > { %1267 = vmax.xlane.f32.xlu0 %v1266_v50 }
 0x892   : > { %1111 = vrot.lane.b32.xlu0 %v3338_v32, %s3238_s29 }
 0x896   : > { %1440 = vrot.lane.b32.xlu0 %v3362_v41, %s3234_s20 }
 0x89a   : > { %1603 = vrot.lane.b32.xlu0 %v3362_v41, %s3233_s19 }
 0x909   : > { %v1268_v51 = vpop.xlane.xlu0 %1267 }
 0x90a   : > { %v1269_v52 = vsub.f32 %v1263_v48, %v1268_v51 }
 0x90c   : > { %v1270_v53 = vmul.f32 1.442695, %v1269_v52 }
 0x90d   : > { %v3461_v54 = vpop.permute.xlu0 %1111 }
 0x90e   : > { %3160 = vpow2.f32 %v1270_v53  ;;  %2971 = vmatpush3.msra.mxu0 %v3461_v54 }
 0x90f   : > { %2973 = vmatmul.mubr.msk.f32.vlgmr.msra.gmra.mrb[10].mxu0 %vm464_vm3, %v1106_v44  ;;  %2980 = vmatprep.subr.mxu0 %v3231_v38 }
 0x910   : > { %2981 = vmatpush3.msra.mxu0 %v1278_v47  ;;  %2982 = vmatprep.mubr.msk.f32.mxu0 %vm3232_vm2, %v3231_v38 }
 0x911   : > { %2990 = vmatprep.subr.mxu0 %v3231_v38  ;;  %v1441_v59 = vpop.permute.xlu0 %1440 }
 0x915   : > { %v1604_v61 = vpop.permute.xlu0 %1603 }
 0x918   : > { %v3161_v32 = vpop.eup %3160 }
 0x919   : > { %v1272_v55 = vsel %vm464_vm3, %v3161_v32, 0.0 }
 0x91a   : > { %1273 = vadd.xlane.f32.xlu1 %v1272_v55 }
 0x92b   : > { %1605 = vrot.lane.b32.xlu1 %v3362_v41, %s3235_s23 }
 0x9a7   : > { %v1274_v56 = vpop.xlane.xlu1 %1273 }
 0x9a8   : > { %3162 = vrcp.f32 %v1274_v56 }
 0x9ab   : > { %v1606_v60 = vpop.permute.xlu1 %1605 }
 0x9b2   : > { %v3163_v57 = vpop.eup %3162 }
 0x9b3   : > { %v1276_v58 = vmul.f32 %v3163_v57, %v3161_v32 }
 0x9b5   : > { %2983 = vmatmul.mubr.msk.f32.vlgmr.msra.gmra.mrb[12].mxu0 %vm464_vm3, %v1276_v58 }
 0x9b6   : > { %2991 = vmatpush3.xpose.msk.msra.mxu0 %vm464_vm3, %v1441_v59  ;;  %2992 = vmatprep.mubr.msk.f32.mxu0 %vm3232_vm2, %v3231_v38 }
 0x9b7   : > { %3000 = vmatprep.subr.mxu0 %v3231_v38 }
 0x9b9   : > { %2993 = vmatmul.mubr.msk.f32.vlgmr.msra.gmra.mrb[14].mxu0 %vm464_vm3, %v3362_v41 }
 0x9ba   : > { %3001 = vmatpush3.xpose.msk.msra.mxu0 %vm464_vm3, %v1606_v60  ;;  %3002 = vmatprep.mubr.msk.f32.mxu0 %vm3232_vm2, %v3231_v38 }
 0x9bb   : > { %3010 = vmatprep.subr.mxu0 %v3231_v38 }
 0x9bd   : > { %3003 = vmatmul.mubr.msk.f32.vlgmr.msra.gmra.mrb[16].mxu0 %vm464_vm3, %v1604_v61 }
 0x9be   : > { %3011 = vmatpush3.msra.mxu0 %v3407_v7  ;;  %3012 = vmatprep.mubr.msk.f32.mxu0 %vm3232_vm2, %v3231_v38 }
 0x9bf   : > { %3020 = vmatprep.subr.mxu0 %v3231_v38 }
 0x9e2   : > { %v1183_v62 = vpop.f32.mrb[10].mxu0 }
 0x9e3   : > { %v1187_v63 = vadd.f32 %v1183_v62, %v942_v42  ;;  %v2974_v0 = vpop.f32.mrb[11].mxu0 }
 0x9e4   : > { %v2830_v0 = vld [vmem:[%s3308_s10 + $0x1] ss:$0 sm:$0xff] }
 0xa88   : > { %v1349_v1 = vpop.f32.mrb[12].mxu0 }
 0xa89   : > { %v2984_v2 = vpop.f32.mrb[13].mxu0 }
 0xa8c   : > { %v1512_v4 = vpop.f32.mrb[14].mxu0 }
 0xa8d   : > { %v1513_v5 = vadd.f32 %v3491_v3, %v1512_v4  ;;  %v2994_v6 = vpop.f32.mrb[15].mxu0 }
 0xa8f   : > { %v1516_v7 = vsel %vm464_vm3, %v1513_v5, -inf }
 0xa90   : > { %1517 = vmax.xlane.f32.xlu1 %v1516_v7  ;;  %v1677_v8 = vpop.f32.mrb[16].mxu0 }
 0xa91   : > { %v1678_v9 = vadd.f32 %v3491_v3, %v1677_v8  ;;  %v3004_v10 = vpop.f32.mrb[17].mxu0 }
 0xa93   : > { %v1681_v11 = vsel %vm464_vm3, %v1678_v9, -inf }
 0xa94   : > { %1682 = vmax.xlane.f32.xlu0 %v1681_v11 }
 0xaa1   : > { %1527 = vrot.lane.b32.xlu1 %v3362_v41, %s3237_s27 }
 0xb1d   : > { %v1518_v12 = vpop.xlane.xlu1 %1517 }
 0xb1e   : > { %v1519_v13 = vsub.f32 %v1513_v5, %v1518_v12 }
 0xb20   : > { %v1520_v14 = vmul.f32 1.442695, %v1519_v13 }
 0xb21   : > { %v1683_v15 = vpop.xlane.xlu0 %1682  ;;  %v1528_v22 = vpop.permute.xlu1 %1527 }
 0xb22   : > { %3164 = vpow2.f32 %v1520_v14  ;;  %v1684_v16 = vsub.f32 %v1678_v9, %v1683_v15 }
 0xb24   : > { %v1685_v17 = vmul.f32 1.442695, %v1684_v16 }
 0xb26   : > { %3166 = vpow2.f32 %v1685_v17 }
 0xb2c   : > { %v3165_v18 = vpop.eup %3164 }
 0xb2d   : > { %v1522_v19 = vsel %vm464_vm3, %v3165_v18, 0.0 }
 0xb2e   : > { %1523 = vadd.xlane.f32.xlu0 %v1522_v19 }
 0xb30   : > { %v3167_v20 = vpop.eup %3166 }
 0xb31   : > { %v1687_v21 = vsel %vm464_vm3, %v3167_v20, 0.0 }
 0xb32   : > { %1688 = vadd.xlane.f32.xlu1 %v1687_v21 }
 0xb43   : > { %1692 = vrot.lane.b32.xlu1 %v3362_v41, %s3236_s26 }
 0xb44   : > { %1354 = vrot.lane.b32.xlu0 %v3343_v34, %s3238_s29 }
 0xb47   : > { %1914 = vrot.lane.b32.xlu1 %v3362_v41, %s3240_s8 }
 0xb48   : > { %1916 = vrot.lane.b32.xlu0 %v3362_v41, %s3239_s30 }
 0xbbb   : > { %v1524_v23 = vpop.xlane.xlu0 %1523 }
 0xbbc   : > { %3168 = vrcp.f32 %v1524_v23 }
 0xbbf   : > { %v1689_v24 = vpop.xlane.xlu1 %1688  ;;  %v3509_v25 = vpop.permute.xlu0 %1354 }
 0xbc0   : > { %3170 = vrcp.f32 %v1689_v24  ;;  %2986 = vmatpush3.msra.mxu1 %v3509_v25 }
 0xbc1   : > { %2988 = vmatmul.mubr.msk.f32.vlgmr.msra.gmra.mrb[10].mxu1 %vm464_vm3, %v1349_v1  ;;  %2995 = vmatprep.subr.mxu1 %v3231_v38 }
 0xbc2   : > { %2996 = vmatpush3.msra.mxu1 %v1528_v22  ;;  %2997 = vmatprep.mubr.msk.f32.mxu1 %vm3232_vm2, %v3231_v38 }
 0xbc3   : > { %3005 = vmatprep.subr.mxu1 %v3231_v38  ;;  %v1693_v28 = vpop.permute.xlu1 %1692  ;;  %v1917_v43 = vpop.permute.xlu0 %1916 }
 0xbc6   : > { %v3169_v34 = vpop.eup %3168 }
 0xbc7   : > { %v1526_v27 = vmul.f32 %v3169_v34, %v3165_v18 }
 0xbc9   : > { %2998 = vmatmul.mubr.msk.f32.vlgmr.msra.gmra.mrb[12].mxu1 %vm464_vm3, %v1526_v27 }
 0xbca   : > { %v3171_v29 = vpop.eup %3170  ;;  %3006 = vmatpush3.msra.mxu1 %v1693_v28  ;;  %3007 = vmatprep.mubr.msk.f32.mxu1 %vm3232_vm2, %v3231_v38 }
 0xbcb   : > { %v1691_v30 = vmul.f32 %v3171_v29, %v3167_v20  ;;  %3015 = vmatprep.subr.mxu1 %v3231_v38 }
 0xbcd   : > { %3008 = vmatmul.mubr.msk.f32.vlgmr.msra.gmra.mrb[14].mxu1 %vm464_vm3, %v1691_v30 }
 0xbce   : > { %3016 = vmatpush3.msra.mxu1 %v3432_v26  ;;  %3017 = vmatprep.mubr.msk.f32.mxu1 %vm3232_vm2, %v3231_v38  ;;  %v1915_v26 = vpop.permute.xlu1 %1914 }
 0xbcf   : > { %3025 = vmatprep.subr.mxu1 %v3231_v38 }
 0xc94   : > { %v1426_v31 = vpop.f32.mrb[10].mxu1 }
 0xc95   : > { %v1430_v33 = vadd.f32 %v1426_v31, %v1187_v63  ;;  %v2989_v36 = vpop.f32.mrb[11].mxu1 }
 0xc97   : > { %v2396_v4 = vadd.f32 %v2830_v0, %v1430_v33 }
 0xc99   : > { %v2398_v9 = vadd.f32 %v2396_v4, %v3345_v35 }
 0xc9b   : > { %v2400_v10 = vsel %vm372_vm1, %v2398_v9, 0.0 }
 0xc9c   : > { %v1599_v39 = vpop.f32.mrb[12].mxu1 }
 0xc9d   : > { %v2999_v40 = vpop.f32.mrb[13].mxu1  ;;  %3018 = vmatmul.mubr.msk.f32.vlgmr.msra.gmra.mrb[16].mxu1 %vm464_vm3, %v1599_v39 }
 0xc9e   : > { %3027 = vmatprep.mubr.msk.f32.mxu1 %vm3232_vm2, %v3231_v38 }
 0xca0   : > { %v1764_v42 = vpop.f32.mrb[14].mxu1 }
 0xca1   : > { %v3009_v44 = vpop.f32.mrb[15].mxu1  ;;  %3013 = vmatmul.mubr.msk.f32.vlgmr.msra.gmra.mrb[18].mxu0 %vm464_vm3, %v1764_v42 }
 0xca2   : > { %3021 = vmatpush3.xpose.msk.msra.mxu0 %vm464_vm3, %v1917_v43  ;;  %3022 = vmatprep.mubr.msk.f32.mxu0 %vm3232_vm2, %v3231_v38 }
 0xca3   : > { %3030 = vmatprep.subr.mxu0 %v3231_v38 }
 0xca5   : > { %3023 = vmatmul.mubr.msk.f32.vlgmr.msra.gmra.mrb[20].mxu0 %vm464_vm3, %v1915_v26 }
 0xca6   : > { %3031 = vmatpush3.msra.mxu0 %v3461_v54  ;;  %3032 = vmatprep.mubr.msk.f32.mxu0 %vm3232_vm2, %v3231_v38 }
 0xca7   : > { %3040 = vmatprep.subr.mxu0 %v3231_v38 }
 0xd70   : > { %v1910_v45 = vpop.f32.mrb[16].mxu1 }
 0xd71   : > { %v3019_v46 = vpop.f32.mrb[17].mxu1 }
 0xd74   : > { %v1837_v48 = vpop.f32.mrb[18].mxu0 }
 0xd75   : > { %v1911_v49 = vadd.f32 %v1910_v45, %v1837_v48  ;;  %v3014_v50 = vpop.f32.mrb[19].mxu0  ;;  %v2831_v45 = vld [vmem:[%s3308_s10 + $0x2] ss:$0 sm:$0xff]  ;;  %v2832_v48 = vld [vmem:[%s3308_s10 + $0x3] ss:$0 sm:$0xff] }
 0xd78   : > { %v1988_v51 = vpop.f32.mrb[20].mxu0 }
 0xd79   : > { %v1989_v52 = vadd.f32 %v3491_v3, %v1988_v51  ;;  %v3024_v53 = vpop.f32.mrb[21].mxu0  ;;  %v348_v51 = vld [vmem:[%s3298_s28 + $0x8] sm:$0xff] }
 0xd7b   : > { %v1992_v47 = vsel %vm464_vm3, %v1989_v52, -inf }
 0xd7c   : > { %1993 = vmax.xlane.f32.xlu0 %v1992_v47  ;;  %v350_v47 = vld [vmem:[%s3298_s28 + $0x28] sm:$0xff] }
 0xd92   : > { %2003 = vrot.lane.b32.xlu0 %v3362_v41, %s3241_s9 }
 0xd96   : > { %2153 = vrot.lane.b32.xlu0 %v3362_v41, %s3243_s12 }
 0xe09   : > { %v1994_v54 = vpop.xlane.xlu0 %1993 }
 0xe0a   : > { %v1995_v32 = vsub.f32 %v1989_v52, %v1994_v54  ;;  %v349_v52 = vld [vmem:[%s3298_s28 + $0x18] sm:$0xff] }
 0xe0b   : > { %v3088_v53 = vpack.c.bf16 %v349_v52, %v348_v51  ;;  %v351_v54 = vld [vmem:[%s3298_s28 + $0x38] sm:$0xff]  ;;  %s3245_s28 = smov [#allocation3]  }
 0xe0c   : > { %v1996_v55 = vmul.f32 1.442695, %v1995_v32  ;;  %v3092_v32 = vpack.c.bf16 %v351_v54, %v350_v47 }
 0xe0d   : > { %v2004_v56 = vpop.permute.xlu0 %2003 }
 0xe0e   : > { %3172 = vpow2.f32 %v1996_v55  ;;  %3026 = vmatpush3.msra.mxu1 %v2004_v56 }
 0xe0f   : > { %3035 = vmatprep.subr.mxu1 %v3231_v38 }
 0xe11   : > { %v2154_v63 = vpop.permute.xlu0 %2153 }
 0xe18   : > { %v3173_v57 = vpop.eup %3172 }
 0xe19   : > { %v1998_v58 = vsel %vm464_vm3, %v3173_v57, 0.0 }
 0xe1a   : > { %1999 = vadd.xlane.f32.xlu1 %v1998_v58 }
 0xe2b   : > { %2155 = vrot.lane.b32.xlu1 %v3362_v41, %s3242_s11 }
 0xea7   : > { %v2000_v59 = vpop.xlane.xlu1 %1999 }
 0xea8   : > { %3174 = vrcp.f32 %v2000_v59 }
 0xeab   : > { %v2156_v62 = vpop.permute.xlu1 %2155 }
 0xeb2   : > { %v3175_v60 = vpop.eup %3174 }
 0xeb3   : > { %v2002_v61 = vmul.f32 %v3175_v60, %v3173_v57 }
 0xeb5   : > { %3028 = vmatmul.mubr.msk.f32.vlgmr.msra.gmra.mrb[18].mxu1 %vm464_vm3, %v2002_v61 }
 0xeb6   : > { %3036 = vmatpush3.xpose.msk.msra.mxu1 %vm464_vm3, %v2156_v62  ;;  %3037 = vmatprep.mubr.msk.f32.mxu1 %vm3232_vm2, %v3231_v38  ;;  %v352_v62 = vld [vmem:[%s3303_s7] sm:$0xff] }
 0xeb7   : > { %3045 = vmatprep.subr.mxu1 %v3231_v38 }
 0xeb9   : > { %3038 = vmatmul.mubr.msk.f32.vlgmr.msra.gmra.mrb[20].mxu1 %vm464_vm3, %v2154_v63  ;;  %v353_v63 = vld [vmem:[%s3303_s7 + $0x8] sm:$0xff] }
 0xeba   : > { %3046 = vmatpush3.msra.mxu1 %v3509_v25  ;;  %3047 = vmatprep.mubr.msk.f32.mxu1 %vm3232_vm2, %v3231_v38 }
 0xf88   : > { %v2075_v1 = vpop.f32.mrb[18].mxu1 }
 0xf89   : > { %v3029_v2 = vpop.f32.mrb[19].mxu1  ;;  %3033 = vmatmul.mubr.msk.f32.vlgmr.msra.gmra.mrb[22].mxu0 %vm464_vm3, %v2075_v1  ;;  %v354_v1 = vld [vmem:[%s3303_s7 + $0x10] sm:$0xff] }
 0xf8a   : > { %3042 = vmatprep.mubr.msk.f32.mxu0 %vm3232_vm2, %v3231_v38  ;;  %v355_v2 = vld [vmem:[%s3303_s7 + $0x18] sm:$0xff] }
 0xf8b   : > { %v3100_v4 = vpack.c.bf16 %v355_v2, %v354_v1 }
 0xf8c   : > { %v2227_v5 = vpop.f32.mrb[20].mxu1 }
 0xf8d   : > { %v2228_v6 = vadd.f32 %v3491_v3, %v2227_v5  ;;  %v3039_v7 = vpop.f32.mrb[21].mxu1  ;;  %v356_v5 = vld [vmem:[%s3303_s7 + $0x20] sm:$0xff] }
 0xf8f   : > { %v2231_v8 = vsel %vm464_vm3, %v2228_v6, -inf }
 0xf90   : > { %2232 = vmax.xlane.f32.xlu1 %v2231_v8  ;;  %v358_v8 = vld [vmem:[%s3303_s7 + $0x30] sm:$0xff] }
 0xf94   : > { %2401 = vadd.xlane.f32.xlu1 %v2400_v10 }
0x101d   : > { %v2233_v11 = vpop.xlane.xlu1 %2232 }
0x101e   : > { %v2234_v12 = vsub.f32 %v2228_v6, %v2233_v11  ;;  %v357_v6 = vld [vmem:[%s3303_s7 + $0x28] sm:$0xff]  ;;  %v2833_v11 = vld [vmem:[%s3308_s10 + $0x4] ss:$0 sm:$0xff] }
0x101f   : > { %v3104_v7 = vpack.c.bf16 %v357_v6, %v356_v5 }
0x1020   : > { %v2235_v13 = vmul.f32 1.442695, %v2234_v12 }
0x1021   : > { %v2402_v22 = vpop.xlane.xlu1 %2401 }
0x1022   : > { %3176 = vpow2.f32 %v2235_v13  ;;  %v2407_v23 = vmul.f32 0.03125, %v2402_v22 }
0x1024   : > { %v2409_v34 = vsub.f32 %v2398_v9, %v2407_v23  ;;  %v359_v9 = vld [vmem:[%s3303_s7 + $0x38] sm:$0xff]  ;;  %s2683_s7 = sshll.u32 %s3245_s28, 4  ;;  %s2684_s7 = int_to_ptr.vmem [resolvable:$true] %s2683_s7 }
0x1025   : > { %v3108_v10 = vpack.c.bf16 %v359_v9, %v358_v8  ;;  %s3192_s17 = scalar_lea.vmem %s2684_s7, 256  ;;  %p3199_p9 = scmp.lt.s32.totalorder %s2684_s7, %s2684_s7 }
0x1026   : > { %v2411_v30 = vmul.f32 %v2409_v34, %v2409_v34  ;;  %p3193_p6 = scmp.ne.s32.totalorder %s2684_s7, %s3192_s17  ;;  %p3200_p10 = scmp.lt.s32.totalorder %s3192_s17, %s3192_s17 }
0x1028   : > { %v2413_v31 = vsel %vm372_vm1, %v2411_v30, 0.0  ;;  %v2836_v30 = vld [vmem:[%s3308_s10 + $0x5] ss:$0 sm:$0xff]  ;;  %p3194_p7 = pnand %p3193_p6, %p3116_p5  ;;  %p3201_p11 = por %p3200_p10, %p3199_p9 }
0x102a   : > { %p3195_p8 = pneg %p3194_p7 }
0x102c   : > { %v3177_v14 = vpop.eup %3176  ;;  %p3202_p12 = pnand %p3201_p11, %p3195_p8 }
0x102d   : > { %v2237_v38 = vsel %vm464_vm3, %v3177_v14, 0.0 }
0x102e   : > { %2238 = vadd.xlane.f32.xlu0 %v2237_v38 }
0x1044   : > { %2242 = vrot.lane.b32.xlu0 %v3362_v41, %s3244_s14 }
0x105c   : > { %v2148_v3 = vpop.f32.mrb[22].mxu0 }
0x105d   : > { %v2152_v15 = vadd.f32 %v2148_v3, %v1911_v49  ;;  %v3034_v16 = vpop.f32.mrb[23].mxu0 }
0x10bb   : > { %v2239_v17 = vpop.xlane.xlu0 %2238 }
0x10bc   : > { %3178 = vrcp.f32 %v2239_v17 }
0x10bf   : > { %v2243_v35 = vpop.permute.xlu0 %2242 }
0x10c0   : > { %3041 = vmatpush3.msra.mxu0 %v2243_v35 }
0x10c1   : > { %3089 = vmatprep.subr.bf16.mxu0 %v3088_v53 }
0x10c6   : > { %v3179_v18 = vpop.eup %3178 }
0x10c7   : > { %v2241_v19 = vmul.f32 %v3179_v18, %v3177_v14 }
0x10c9   : > { %3043 = vmatmul.mubr.msk.f32.vlgmr.msra.gmra.mrb[24].mxu0 %vm464_vm3, %v2241_v19 }
0x10ca   : > { %3091 = vmatpush3.bf16.msra.mxu0 %v3088_v53 }
0x10cb   : > { %3093 = vmatprep.subr.bf16.mxu0 %v3092_v32 }
0x10ce   : > { %3095 = vmatpush3.bf16.msra.mxu0 %v3092_v32 }
0x119c   : > { %v2314_v20 = vpop.f32.mrb[24].mxu0 }
0x119d   : > { %v3044_v21 = vpop.f32.mrb[25].mxu0  ;;  %3048 = vmatmul.mubr.msk.f32.vlgmr.msra.gmra.mrb[22].mxu1 %vm464_vm3, %v2314_v20 }
0x1270   : > { %v2387_v24 = vpop.f32.mrb[22].mxu1 }
0x1271   : > { %v2391_v25 = vadd.f32 %v2387_v24, %v2152_v15  ;;  %v3049_v41 = vpop.f32.mrb[23].mxu1 }
0x1273   : > { %v2397_v27 = vadd.f32 %v2830_v0, %v2391_v25  ;;  %v3096_v0 = vpack.c.bf16 %v353_v63, %v352_v62 }
0x1275   : > { %v2399_v28 = vadd.f32 %v2397_v27, %v3351_v37  ;;  %3097 = vmatprep.subr.bf16.mxu1 %v3096_v0 }
0x1276   : > { %3099 = vmatpush3.bf16.msra.mxu1 %v3096_v0 }
0x1277   : > { %v2403_v29 = vsel %vm372_vm1, %v2399_v28, 0.0  ;;  %3101 = vmatprep.subr.bf16.mxu1 %v3100_v4 }
0x1278   : > { %2404 = vadd.xlane.f32.xlu1 %v2403_v29 }
0x127a   : > { %3103 = vmatpush3.bf16.msra.mxu1 %v3100_v4 }
0x127b   : > { %3105 = vmatprep.subr.bf16.mxu1 %v3104_v7 }
0x127c   : > { %2414 = vadd.xlane.f32.xlu1 %v2413_v31 }
0x127e   : > { %3107 = vmatpush3.bf16.msra.mxu1 %v3104_v7 }
0x127f   : > { %3109 = vmatprep.subr.bf16.mxu1 %v3108_v10 }
0x1282   : > { %3111 = vmatpush3.bf16.msra.mxu1 %v3108_v10 }
0x1305   : > { %v2405_v33 = vpop.xlane.xlu1 %2404 }
0x1306   : > { %v2408_v36 = vmul.f32 0.03125, %v2405_v33 }
0x1308   : > { %v2410_v39 = vsub.f32 %v2399_v28, %v2408_v36 }
0x1309   : > { %v2415_v40 = vpop.xlane.xlu1 %2414 }
0x130a   : > { %v2419_v42 = vmul.f32 0.03125, %v2415_v40  ;;  %v2412_v43 = vmul.f32 %v2410_v39, %v2410_v39 }
0x130c   : > { %v2421_v44 = vadd.f32 1e-05, %v2419_v42  ;;  %v2416_v37 = vsel %vm372_vm1, %v2412_v43, 0.0 }
0x130d   : > { %2417 = vadd.xlane.f32.xlu1 %v2416_v37 }
0x130e   : > { %3180 = vrsqrt.f32 %v2421_v44 }
0x1318   : > { %v3181_v26 = vpop.eup %3180 }
0x1319   : > { %v2425_v46 = vmul.f32 %v3181_v26, %v2409_v34 }
0x131b   : > { %v2431_v49 = vmul.f32 %v2831_v45, %v2425_v46 }
0x131d   : > { %v3577_v50 = vadd.f32 %v2832_v48, %v2431_v49 }
0x131f   : > { %3058 = vmatprep.mubr.msk.f32.mxu0 %vm372_vm1, %v3577_v50 }
0x139a   : > { %v2418_v55 = vpop.xlane.xlu1 %2417 }
0x139b   : > { %v2420_v56 = vmul.f32 0.03125, %v2418_v55 }
0x139d   : > { %v2422_v57 = vadd.f32 1e-05, %v2420_v56 }
0x139f   : > { %3182 = vrsqrt.f32 %v2422_v57 }
0x13a9   : > { %v3183_v58 = vpop.eup %3182 }
0x13aa   : > { %v2426_v59 = vmul.f32 %v3183_v58, %v2410_v39 }
0x13ac   : > { %v2432_v60 = vmul.f32 %v2831_v45, %v2426_v59 }
0x13ae   : > { %v2438_v61 = vadd.f32 %v2832_v48, %v2432_v60 }
0x13b0   : > { %3059 = vmatmul.mubr.msk.f32.vlgmr.msra.gmra.mrb[26].mxu0 %vm372_vm1, %v2438_v61 }
0x1483   : > { %v3060_v12 = vpop.f32.mrb[26].mxu0 }
0x1484   : > { %v2521_v13 = vadd.f32 %v3060_v12, %v2833_v11  ;;  %v2515_v14 = vpop.f32.mrb[27].mxu0 }
0x1485   : > { %v2516_v38 = vadd.f32 %v2833_v11, %v2515_v14 }
0x1486   : > { %v2527_v3 = vmul.f32 0.044715, %v2521_v13  ;;  %v2525_v27 = vmul.f32 0.5, %v2521_v13 }
0x1487   : > { %v2526_v15 = vmul.f32 0.044715, %v2516_v38  ;;  %v2524_v41 = vmul.f32 0.5, %v2516_v38 }
0x1488   : > { %v2529_v16 = vmul.f32 %v2527_v3, %v2521_v13 }
0x1489   : > { %v2528_v17 = vmul.f32 %v2526_v15, %v2516_v38 }
0x148a   : > { %v2531_v35 = vmul.f32 %v2529_v16, %v2521_v13 }
0x148b   : > { %v2530_v18 = vmul.f32 %v2528_v17, %v2516_v38 }
0x148c   : > { %v2533_v19 = vadd.f32 %v2531_v35, %v2521_v13 }
0x148d   : > { %v2532_v20 = vadd.f32 %v2530_v18, %v2516_v38 }
0x148e   : > { %v2535_v21 = vmul.f32 0.7978846, %v2533_v19 }
0x148f   : > { %v2534_v22 = vmul.f32 0.7978846, %v2532_v20 }
0x1490   : > { %3184 = vtanh.f32 %v2535_v21 }
0x1491   : > { %3186 = vtanh.f32 %v2534_v22 }
0x149a   : > { %v3185_v23 = vpop.eup %3184 }
0x149b   : > { %v3187_v24 = vpop.eup %3186  ;;  %v2539_v25 = vadd.f32 1.0, %v3185_v23 }
0x149c   : > { %v2538_v34 = vadd.f32 1.0, %v3187_v24 }
0x149d   : > { %v2541_v29 = vmul.f32 %v2539_v25, %v2525_v27 }
0x149e   : > { %v2540_v28 = vmul.f32 %v2538_v34, %v2524_v41 }
0x14a0   : > { %3077 = vmatprep.mubr.msk.f32.mxu1 %vm2546_vm4, %v2540_v28 }
0x14a1   : > { %3078 = vmatmul.mubr.msk.f32.vlgmr.msra.gmra.mrb[24].mxu1 %vm2546_vm4, %v2541_v29 }
0x1574   : > { %v3079_v31 = vpop.f32.mrb[24].mxu1 }
0x1575   : > { %v2619_v33 = vpop.f32.mrb[25].mxu1  ;;  %v2625_v36 = vadd.f32 %v3079_v31, %v2836_v30 }
0x1576   : > { %v2620_v39 = vadd.f32 %v2836_v30, %v2619_v33 }
0x1577   : > { %v2629_v43 = vadd.f32 %v2625_v36, %v2438_v61 }
0x1578   : > { %v2628_v40 = vadd.f32 %v2620_v39, %v3577_v50 }
0x1579   : > { %v2633_v44 = vsel %vm372_vm1, %v2629_v43, 0.0 }
0x157a   : > { %v2630_v42 = vsel %vm372_vm1, %v2628_v40, 0.0 }
0x157b   : > { %2631 = vadd.xlane.f32.xlu1 %v2630_v42 }
0x157f   : > { %2634 = vadd.xlane.f32.xlu1 %v2633_v44 }
0x1608   : > { %v2632_v37 = vpop.xlane.xlu1 %2631 }
0x1609   : > { %v2636_v26 = vmul.f32 0.03125, %v2632_v37 }
0x160b   : > { %v2638_v45 = vsub.f32 %v2628_v40, %v2636_v26 }
0x160c   : > { %v2635_v46 = vpop.xlane.xlu1 %2634 }
0x160d   : > { %v2637_v48 = vmul.f32 0.03125, %v2635_v46  ;;  %v2640_v49 = vmul.f32 %v2638_v45, %v2638_v45 }
0x160f   : > { %v2639_v51 = vsub.f32 %v2629_v43, %v2637_v48  ;;  %v2642_v52 = vsel %vm372_vm1, %v2640_v49, 0.0 }
0x1610   : > { %2643 = vadd.xlane.f32.xlu0 %v2642_v52 }
0x1611   : > { %v2641_v50 = vmul.f32 %v2639_v51, %v2639_v51 }
0x1613   : > { %v2645_v53 = vsel %vm372_vm1, %v2641_v50, 0.0 }
0x1614   : > { %2646 = vadd.xlane.f32.xlu1 %v2645_v53 }
0x1615   : > { %3205 = shalt.err (!%p3202_p12)
}
0x1616   : > { %s3206_s20 = scalar_lea.hbm %s3640_s5, 256 }
0x1617   : > { %p3207_p13 = scmp.ne.s32.totalorder %s3640_s5, %s3206_s20  ;;  %p3212_p2 = scmp.lt.u32.totalorder %s3206_s20, %s3640_s5 }
0x1619   : > { %p3208_p0 = pnand %p3207_p13, %p3116_p5 }
0x161b   : > { %p3209_p1 = pneg %p3208_p0 }
0x161d   : > { %p3214_p3 = pnand %p3212_p2, %p3209_p1 }
0x161f   : > { %3217 = shalt.err (!%p3214_p3)
}
0x1620   : > { %s3246_s27 = smov 128   ;;  %s3247_s29 = smov 8   ;;  %v2839_v59 = vld [vmem:[%s3308_s10 + $0x6] ss:$0 sm:$0xff]  ;;  %v2840_v61 = vld [vmem:[%s3308_s10 + $0x7] ss:$0 sm:$0xff] }
0x1621   : > { %3113 = dma.vmem_to_hbm [thread:$0]  (%p3116_p5), %s2684_s7, 256, %s3640_s5, [#allocation4], %s3246_s27, %s3246_s27, %s3247_s29  }
0x169d   : > { %v2644_v47 = vpop.xlane.xlu0 %2643 }
0x169e   : > { %v2648_v54 = vmul.f32 0.03125, %v2644_v47 }
0x16a0   : > { %v2650_v32 = vadd.f32 1e-05, %v2648_v54 }
0x16a1   : > { %v2647_v55 = vpop.xlane.xlu1 %2646 }
0x16a2   : > { %3188 = vrsqrt.f32 %v2650_v32  ;;  %v2649_v56 = vmul.f32 0.03125, %v2647_v55 }
0x16a4   : > { %v2651_v57 = vadd.f32 1e-05, %v2649_v56 }
0x16a6   : > { %3190 = vrsqrt.f32 %v2651_v57 }
0x16ac   : > { %v3189_v58 = vpop.eup %3188 }
0x16ad   : > { %v2654_v60 = vmul.f32 %v3189_v58, %v2638_v45 }
0x16af   : > { %v2660_v62 = vmul.f32 %v2839_v59, %v2654_v60 }
0x16b0   : > { %v3191_v63 = vpop.eup %3190 }
0x16b1   : > { %v2666_v0 = vadd.f32 %v2840_v61, %v2660_v62  ;;  %v2655_v1 = vmul.f32 %v3191_v63, %v2639_v51 }
0x16b3   : > { %2668 = vst.msk [vmem:[#allocation2] sm:$0xff] %vm372_vm1, %v2666_v0  ;;  %2670 = vst.msk [vmem:[%s3313_s13] sm:$0xff] %vm372_vm1, %v2666_v0  ;;  %v2661_v2 = vmul.f32 %v2839_v59, %v2655_v1 }
0x16b5   : > { %v2667_v4 = vadd.f32 %v2840_v61, %v2661_v2 }
0x16b7   : > { %2669 = vst.msk [vmem:[#allocation2 + $0x8] sm:$0xff] %vm372_vm1, %v2667_v4  ;;  %2671 = vst.msk [vmem:[%s3313_s13 + $0x8] sm:$0xff] %vm372_vm1, %v2667_v4 }
0x16b8   : > { %3223 = dma.done.wait (%p3116_p5), [#allocation4], 256  }
0x16b9   : > { %3225 = vsyncadd (%p3116_p5), [#allocation4], 4294967040 }
0x16ba PF: > { %s18_s21 = sadd.s32 1, %s3228_s21  }
0x16bb   : > { %p15_p4 = scmp.ge.s32.totalorder %s18_s21, 4  }
0x16bd   :  { %17 = sbr.rel (!%p15_p4) target bundleno = 1 (0x1), region = 90 }
0x16c4   :  { %2710 = vsyncpa [#allocation4], 1 }
0x16c5   :  { %2712 = vsyncpa [#allocation4 + $0x1], 1 }

</bundles_post_ra>
